<compile_context>
chip_gen: v5e
topology: v5e:2x2
jax: 0.10.0
libtpu: 0.0.40
codegen_flags: <defaults>
</compile_context>

<pallas_src>
import functools

import numpy as np

import jax
import jax.numpy as jnp
from jax import lax
from jax.experimental import pallas as pl
from jax.experimental.pallas import tpu as pltpu


# ---------------------------------------------------------------------------
# The single fused Pallas kernel (one grid block = TB batch elements)
# ---------------------------------------------------------------------------
# In-kernel layouts (tb = batch tile, rows are (spatial, b_local) interleaved):
#   x   : (28*tb, 28)    rows = (h, b),   cols = w
#   h1  : (24*tb, 256)   rows = (oh, b),  cols = [even ow: c*12+pw | pad |
#                                                 odd  ow: 128 + c*12+pw | pad]
#   p1  : (24*tb, 128)   valid rows at 2*ph*tb + b, cols = c*12+pw (72 valid)
#   h2  : (16*tb, 128)   valid rows at 2*oh2*tb + b, cols = even|odd ow2 blocks
#   p2  : (16*tb, 64)    valid rows at 4*ph2*tb + b, cols = c2*4+pw2
#   out : (tb, 10)
def _lenet_fused_kernel(x_ref, g1_ref, b1_ref, g2_ref, b2_ref,
                        wf1_ref, bf1_ref, wf2_ref, bf2_ref, wf3_ref, bf3_ref,
                        o_ref, *, tb):
    f32 = jnp.float32
    bf16 = jnp.bfloat16

    def mm(a, b):
        # bf16 x bf16 -> f32 accumulation (native MXU path); both operands are
        # already bf16 by construction.
        return jnp.dot(a, b, preferred_element_type=f32)

    def shift_rows(a, n):
        # s[r, :] = a[r + n, :] for r < R - n (wrapped rows are don't-care:
        # they only ever land in garbage output rows).
        return jnp.concatenate([a[n:, :], a[:n, :]], axis=0)

    x = x_ref[...]                                                # (28tb, 28) bf16

    # ---- conv1 + bias + ReLU: 5 shifted band matmuls (K=28, N=256) ----
    acc1 = mm(x[0:24 * tb, :], g1_ref[0])
    for i in range(1, 5):
        acc1 = acc1 + mm(x[i * tb:(i + 24) * tb, :], g1_ref[i])
    h1 = jnp.maximum(acc1 + b1_ref[...], 0.0)                     # (24tb, 256) f32

    # ---- pool1 on VPU: column pairs are the two 128-lane halves, row pairs
    #      are tb rows apart.  No compaction: valid rows stay at even oh.
    c1 = jnp.maximum(h1[:, :128], h1[:, 128:])                    # (24tb, 128)
    p1 = jnp.maximum(c1, shift_rows(c1, tb)).astype(bf16)         # (24tb, 128)

    # ---- conv2 + bias + ReLU: reads every other row-block of p1 ----
    acc2 = mm(p1[0:16 * tb, :], g2_ref[0])
    for i in range(1, 5):
        acc2 = acc2 + mm(p1[2 * i * tb:(2 * i + 16) * tb, :], g2_ref[i])
    h2 = jnp.maximum(acc2 + b2_ref[...], 0.0)                     # (16tb, 128) f32

    # ---- pool2: column halves at lane 64 (shift of half the width is
    #      direction-agnostic), row pairs 2*tb rows apart.
    c2 = jnp.maximum(h2, pltpu.roll(h2, shift=64, axis=1))[:, :64]  # (16tb, 64)
    p2 = jnp.maximum(c2, shift_rows(c2, 2 * tb)).astype(bf16)       # (16tb, 64)

    # ---- fc1 (+ReLU): flatten folded into 4 accumulated matmuls over ph2 ----
    a1 = mm(p2[0:tb, :], wf1_ref[0])
    for h in range(1, 4):
        a1 = a1 + mm(p2[4 * h * tb:(4 * h + 1) * tb, :], wf1_ref[h])
    a1 = jnp.maximum(a1 + bf1_ref[...], 0.0).astype(bf16)         # (tb, 120)

    # ---- fc2 (+ReLU), fc3 ----
    a2 = jnp.maximum(mm(a1, wf2_ref[...]) + bf2_ref[...], 0.0).astype(bf16)
    out = mm(a2, wf3_ref[...]) + bf3_ref[...]                     # (tb, 10) f32

    o_ref[...] = out.astype(o_ref.dtype)


# ---------------------------------------------------------------------------
# One-time host-side weight packing (batch-independent).
# ---------------------------------------------------------------------------
def prepare_params(params):
    w1 = np.asarray(params["conv1_w"], np.float32)    # (6,1,5,5)
    b1 = np.asarray(params["conv1_b"], np.float32)    # (6,)
    w2 = np.asarray(params["conv2_w"], np.float32)    # (16,6,5,5)
    b2 = np.asarray(params["conv2_b"], np.float32)    # (16,)
    fc1_w = np.asarray(params["fc1_w"], np.float32)   # (256,120)
    fc1_b = np.asarray(params["fc1_b"], np.float32)
    fc2_w = np.asarray(params["fc2_w"], np.float32)   # (120,84)
    fc2_b = np.asarray(params["fc2_b"], np.float32)
    fc3_w = np.asarray(params["fc3_w"], np.float32)   # (84,10)
    fc3_b = np.asarray(params["fc3_b"], np.float32)

    # conv1 band matrices.  Output columns: even ow -> c*12 + ow//2 (cols 0..71),
    # odd ow -> 128 + c*12 + ow//2 (cols 128..199); the rest are zero pad so the
    # two pool halves are lane-tile aligned.
    def col1(c, ow):
        return (0 if ow % 2 == 0 else 128) + c * 12 + ow // 2

    g1 = np.zeros((5, 28, 256), np.float32)
    b1row = np.zeros((1, 256), np.float32)
    for i in range(5):
        for c in range(6):
            for ow in range(24):
                g1[i, ow:ow + 5, col1(c, ow)] = w1[c, 0, i, :]
    for c in range(6):
        for ow in range(24):
            b1row[0, col1(c, ow)] = b1[c]

    # conv2 band matrices: input cols = pooled layout (c*12 + pw, 72 valid of
    # 128); output cols: even ow2 -> c2*4 + ow2//2, odd ow2 -> 64 + c2*4 + ow2//2.
    def col2(c2, ow2):
        return (0 if ow2 % 2 == 0 else 64) + c2 * 4 + ow2 // 2

    g2 = np.zeros((5, 128, 128), np.float32)
    b2row = np.zeros((1, 128), np.float32)
    for i in range(5):
        for c2 in range(16):
            for ow2 in range(8):
                for c in range(6):
                    g2[i, c * 12 + ow2: c * 12 + ow2 + 5, col2(c2, ow2)] = w2[c2, c, i, :]
    for c2 in range(16):
        for ow2 in range(8):
            b2row[0, col2(c2, ow2)] = b2[c2]

    # fc1: regroup rows from PyTorch NCHW flatten order (c2*16 + h*4 + w) into
    # wf1[h][c2*4 + w, :] to match the kernel's p2 column layout.
    wf1 = np.zeros((4, 64, 120), np.float32)
    for h in range(4):
        for c2 in range(16):
            for w in range(4):
                wf1[h, c2 * 4 + w, :] = fc1_w[c2 * 16 + h * 4 + w, :]

    bf16 = jnp.bfloat16
    return {
        "g1": jnp.asarray(g1, bf16), "b1": jnp.asarray(b1row),
        "g2": jnp.asarray(g2, bf16), "b2": jnp.asarray(b2row),
        "wf1": jnp.asarray(wf1, bf16), "bf1": jnp.asarray(fc1_b[None, :]),
        "wf2": jnp.asarray(fc2_w, bf16), "bf2": jnp.asarray(fc2_b[None, :]),
        "wf3": jnp.asarray(fc3_w, bf16), "bf3": jnp.asarray(fc3_b[None, :]),
    }


# ---------------------------------------------------------------------------
# Forward wrapper: one tiny input relayout in XLA, then a single pallas_call
# over a parallel batch grid.
# ---------------------------------------------------------------------------
def lenet_forward(kparams, x_nchw, *, batch_tile=None):
    B = x_nchw.shape[0]
    tb = batch_tile if batch_tile is not None else min(B, 128)
    assert B % tb == 0, "batch must be a multiple of the batch tile"
    nb = B // tb
    if nb > 1:
        assert tb % 8 == 0, "multi-block grids need a sublane-aligned batch tile"

    # (B,1,28,28) -> (nb, 28*tb, 28); within a block rows are ordered (h, b_local).
    x2 = x_nchw[:, 0, :, :].reshape(nb, tb, 28, 28)
    x2 = jnp.transpose(x2, (0, 2, 1, 3)).reshape(nb, 28 * tb, 28)
    x2 = x2.astype(jnp.bfloat16)

    def const_spec(arr):
        nd = arr.ndim
        return pl.BlockSpec(arr.shape, lambda g, _nd=nd: (0,) * _nd)

    weights = (kparams["g1"], kparams["b1"], kparams["g2"], kparams["b2"],
               kparams["wf1"], kparams["bf1"], kparams["wf2"], kparams["bf2"],
               kparams["wf3"], kparams["bf3"])

    kernel = functools.partial(_lenet_fused_kernel, tb=tb)
    return pl.pallas_call(
        kernel,
        grid=(nb,),
        out_shape=jax.ShapeDtypeStruct((B, 10), jnp.float32),
        in_specs=[pl.BlockSpec((None, 28 * tb, 28), lambda g: (g, 0, 0))]
                 + [const_spec(w) for w in weights],
        out_specs=pl.BlockSpec((tb, 10), lambda g: (g, 0)),
        compiler_params=pltpu.CompilerParams(
            dimension_semantics=("parallel",),
            vmem_limit_bytes=32 * 1024 * 1024),
    )(x2, *weights)


# ---------------------------------------------------------------------------
# Pure-JAX reference (correctness check only)
# ---------------------------------------------------------------------------
def lenet_reference(params, x_nchw):
    def conv(x, w, b):
        y = lax.conv_general_dilated(
            x, w, (1, 1), "VALID",
            dimension_numbers=("NCHW", "OIHW", "NCHW"),
            precision=lax.Precision.HIGHEST,
        )
        return jnp.maximum(y + b[None, :, None, None], 0.0)

    def pool(x):
        return lax.reduce_window(
            x, -jnp.inf, lax.max, (1, 1, 2, 2), (1, 1, 2, 2), "VALID"
        )

    def dense(x, w, b):
        return jnp.dot(x, w, precision=lax.Precision.HIGHEST) + b

    h = pool(conv(x_nchw, params["conv1_w"], params["conv1_b"]))
    h = pool(conv(h, params["conv2_w"], params["conv2_b"]))
    feats = h.reshape(h.shape[0], -1)                 # PyTorch NCHW flatten
    h = jnp.maximum(dense(feats, params["fc1_w"], params["fc1_b"]), 0.0)
    h = jnp.maximum(dense(h, params["fc2_w"], params["fc2_b"]), 0.0)
    return dense(h, params["fc3_w"], params["fc3_b"])


# ---------------------------------------------------------------------------
# Deterministic parameter init (PyTorch-like uniform fan-in init)
# ---------------------------------------------------------------------------
def init_params(key):
    def u(k, shape, fan_in):
        bound = 1.0 / (fan_in ** 0.5)
        return jax.random.uniform(k, shape, jnp.float32, -bound, bound)

    ks = jax.random.split(key, 10)
    return {
        "conv1_w": u(ks[0], (6, 1, 5, 5), 1 * 5 * 5),
        "conv1_b": u(ks[1], (6,), 1 * 5 * 5),
        "conv2_w": u(ks[2], (16, 6, 5, 5), 6 * 5 * 5),
        "conv2_b": u(ks[3], (16,), 6 * 5 * 5),
        "fc1_w": u(ks[4], (256, 120), 256),   # stored as (in, out)
        "fc1_b": u(ks[5], (120,), 256),
        "fc2_w": u(ks[6], (120, 84), 120),
        "fc2_b": u(ks[7], (84,), 120),
        "fc3_w": u(ks[8], (84, 10), 84),
        "fc3_b": u(ks[9], (10,), 84),
    }


if __name__ == "__main__":
    root = jax.random.PRNGKey(0)
    pkey, xkey = jax.random.split(root)
    params = init_params(pkey)

    # LeNet's classifier input of 256 = 16*4*4 implies 1x28x28 inputs.
    B = 2
    x = jax.random.normal(xkey, (B, 1, 28, 28), dtype=jnp.float32)

    # One-time host-side packing of weights into kernel layout (batch-agnostic).
    kparams = prepare_params(params)

    fwd = jax.jit(functools.partial(lenet_forward, batch_tile=B))
    out = jax.block_until_ready(fwd(kparams, x))
    assert out.shape == (B, 10) and out.dtype == jnp.float32

    ref = jax.block_until_ready(lenet_reference(params, x))
    assert jnp.allclose(out, ref, rtol=2e-2, atol=2e-2), (out, ref)

    print("KERNEL_OK")
</pallas_src>

<mosaic_0001>
module attributes {stable_mosaic.version = 11 : i64} {
  func.func @_lenet_fused_kernel(%arg0: i32, %arg1: memref<1x56x28xbf16, #tpu.memory_space<vmem>>, %arg2: memref<5x28x256xbf16, #tpu.memory_space<vmem>>, %arg3: memref<1x256xf32, #tpu.memory_space<vmem>>, %arg4: memref<5x128x128xbf16, #tpu.memory_space<vmem>>, %arg5: memref<1x128xf32, #tpu.memory_space<vmem>>, %arg6: memref<4x64x120xbf16, #tpu.memory_space<vmem>>, %arg7: memref<1x120xf32, #tpu.memory_space<vmem>>, %arg8: memref<120x84xbf16, #tpu.memory_space<vmem>>, %arg9: memref<1x84xf32, #tpu.memory_space<vmem>>, %arg10: memref<84x10xbf16, #tpu.memory_space<vmem>>, %arg11: memref<1x10xf32, #tpu.memory_space<vmem>>, %arg12: memref<2x10xf32, #tpu.memory_space<vmem>>) attributes {dimension_semantics = [#tpu.dimension_semantics<parallel>], iteration_bounds = array<i64: 1>, scalar_prefetch = 0 : i64, scratch_operands = 0 : i64, tpu.core_type = #tpu.core_type<tc>, window_params = [{transform_indices = @transform_0, window_bounds = array<i64: 1, 56, 28>}, {pipeline_mode = #tpu.pipeline_mode<synchronous>, transform_indices = @transform_1, window_bounds = array<i64: 5, 28, 256>}, {pipeline_mode = #tpu.pipeline_mode<synchronous>, transform_indices = @transform_2, window_bounds = array<i64: 1, 256>}, {pipeline_mode = #tpu.pipeline_mode<synchronous>, transform_indices = @transform_3, window_bounds = array<i64: 5, 128, 128>}, {pipeline_mode = #tpu.pipeline_mode<synchronous>, transform_indices = @transform_4, window_bounds = array<i64: 1, 128>}, {pipeline_mode = #tpu.pipeline_mode<synchronous>, transform_indices = @transform_5, window_bounds = array<i64: 4, 64, 120>}, {pipeline_mode = #tpu.pipeline_mode<synchronous>, transform_indices = @transform_6, window_bounds = array<i64: 1, 120>}, {pipeline_mode = #tpu.pipeline_mode<synchronous>, transform_indices = @transform_7, window_bounds = array<i64: 120, 84>}, {pipeline_mode = #tpu.pipeline_mode<synchronous>, transform_indices = @transform_8, window_bounds = array<i64: 1, 84>}, {pipeline_mode = #tpu.pipeline_mode<synchronous>, transform_indices = @transform_9, window_bounds = array<i64: 84, 10>}, {pipeline_mode = #tpu.pipeline_mode<synchronous>, transform_indices = @transform_10, window_bounds = array<i64: 1, 10>}, {transform_indices = @transform_11, window_bounds = array<i64: 2, 10>}]} {
    %c0 = arith.constant 0 : index
    %c0_0 = arith.constant 0 : index
    %c0_1 = arith.constant 0 : index
    %0 = vector.load %arg1[%c0, %c0_0, %c0_1] : memref<1x56x28xbf16, #tpu.memory_space<vmem>>, vector<1x56x28xbf16>
    %1 = vector.shape_cast %0 : vector<1x56x28xbf16> to vector<56x28xbf16>
    %2 = vector.extract_strided_slice %1 {offsets = [0, 0], sizes = [48, 28], strides = [1, 1]} : vector<56x28xbf16> to vector<48x28xbf16>
    %c0_2 = arith.constant 0 : index
    %c0_3 = arith.constant 0 : index
    %c0_4 = arith.constant 0 : index
    %3 = vector.load %arg2[%c0_2, %c0_3, %c0_4] : memref<5x28x256xbf16, #tpu.memory_space<vmem>>, vector<1x28x256xbf16>
    %4 = vector.shape_cast %3 : vector<1x28x256xbf16> to vector<28x256xbf16>
    %cst = arith.constant dense<0.000000e+00> : vector<48x256xf32>
    %5 = tpu.matmul %2, %4, %cst {dimension_numbers = #tpu.dot_dimension_numbers<[1], [0], [0], [1], [0, 0, 1, 1], [], []>} : vector<48x28xbf16>, vector<28x256xbf16>, vector<48x256xf32> -> vector<48x256xf32>
    %6 = vector.extract_strided_slice %1 {offsets = [2, 0], sizes = [48, 28], strides = [1, 1]} : vector<56x28xbf16> to vector<48x28xbf16>
    %c1 = arith.constant 1 : index
    %c0_5 = arith.constant 0 : index
    %c0_6 = arith.constant 0 : index
    %7 = vector.load %arg2[%c1, %c0_5, %c0_6] : memref<5x28x256xbf16, #tpu.memory_space<vmem>>, vector<1x28x256xbf16>
    %8 = vector.shape_cast %7 : vector<1x28x256xbf16> to vector<28x256xbf16>
    %cst_7 = arith.constant dense<0.000000e+00> : vector<48x256xf32>
    %9 = tpu.matmul %6, %8, %cst_7 {dimension_numbers = #tpu.dot_dimension_numbers<[1], [0], [0], [1], [0, 0, 1, 1], [], []>} : vector<48x28xbf16>, vector<28x256xbf16>, vector<48x256xf32> -> vector<48x256xf32>
    %10 = arith.addf %5, %9 : vector<48x256xf32>
    %11 = vector.extract_strided_slice %1 {offsets = [4, 0], sizes = [48, 28], strides = [1, 1]} : vector<56x28xbf16> to vector<48x28xbf16>
    %c2 = arith.constant 2 : index
    %c0_8 = arith.constant 0 : index
    %c0_9 = arith.constant 0 : index
    %12 = vector.load %arg2[%c2, %c0_8, %c0_9] : memref<5x28x256xbf16, #tpu.memory_space<vmem>>, vector<1x28x256xbf16>
    %13 = vector.shape_cast %12 : vector<1x28x256xbf16> to vector<28x256xbf16>
    %cst_10 = arith.constant dense<0.000000e+00> : vector<48x256xf32>
    %14 = tpu.matmul %11, %13, %cst_10 {dimension_numbers = #tpu.dot_dimension_numbers<[1], [0], [0], [1], [0, 0, 1, 1], [], []>} : vector<48x28xbf16>, vector<28x256xbf16>, vector<48x256xf32> -> vector<48x256xf32>
    %15 = arith.addf %10, %14 : vector<48x256xf32>
    %16 = vector.extract_strided_slice %1 {offsets = [6, 0], sizes = [48, 28], strides = [1, 1]} : vector<56x28xbf16> to vector<48x28xbf16>
    %c3 = arith.constant 3 : index
    %c0_11 = arith.constant 0 : index
    %c0_12 = arith.constant 0 : index
    %17 = vector.load %arg2[%c3, %c0_11, %c0_12] : memref<5x28x256xbf16, #tpu.memory_space<vmem>>, vector<1x28x256xbf16>
    %18 = vector.shape_cast %17 : vector<1x28x256xbf16> to vector<28x256xbf16>
    %cst_13 = arith.constant dense<0.000000e+00> : vector<48x256xf32>
    %19 = tpu.matmul %16, %18, %cst_13 {dimension_numbers = #tpu.dot_dimension_numbers<[1], [0], [0], [1], [0, 0, 1, 1], [], []>} : vector<48x28xbf16>, vector<28x256xbf16>, vector<48x256xf32> -> vector<48x256xf32>
    %20 = arith.addf %15, %19 : vector<48x256xf32>
    %21 = vector.extract_strided_slice %1 {offsets = [8, 0], sizes = [48, 28], strides = [1, 1]} : vector<56x28xbf16> to vector<48x28xbf16>
    %c4 = arith.constant 4 : index
    %c0_14 = arith.constant 0 : index
    %c0_15 = arith.constant 0 : index
    %22 = vector.load %arg2[%c4, %c0_14, %c0_15] : memref<5x28x256xbf16, #tpu.memory_space<vmem>>, vector<1x28x256xbf16>
    %23 = vector.shape_cast %22 : vector<1x28x256xbf16> to vector<28x256xbf16>
    %cst_16 = arith.constant dense<0.000000e+00> : vector<48x256xf32>
    %24 = tpu.matmul %21, %23, %cst_16 {dimension_numbers = #tpu.dot_dimension_numbers<[1], [0], [0], [1], [0, 0, 1, 1], [], []>} : vector<48x28xbf16>, vector<28x256xbf16>, vector<48x256xf32> -> vector<48x256xf32>
    %25 = arith.addf %20, %24 : vector<48x256xf32>
    %c0_17 = arith.constant 0 : index
    %c0_18 = arith.constant 0 : index
    %26 = vector.load %arg3[%c0_17, %c0_18] : memref<1x256xf32, #tpu.memory_space<vmem>>, vector<1x256xf32>
    %27 = vector.broadcast %26 : vector<1x256xf32> to vector<48x256xf32>
    %28 = arith.addf %25, %27 : vector<48x256xf32>
    %cst_19 = arith.constant 0.000000e+00 : f32
    %29 = vector.broadcast %cst_19 : f32 to vector<48x256xf32>
    %30 = arith.maximumf %28, %29 : vector<48x256xf32>
    %31 = vector.extract_strided_slice %30 {offsets = [0, 0], sizes = [48, 128], strides = [1, 1]} : vector<48x256xf32> to vector<48x128xf32>
    %32 = vector.extract_strided_slice %30 {offsets = [0, 128], sizes = [48, 128], strides = [1, 1]} : vector<48x256xf32> to vector<48x128xf32>
    %33 = arith.maximumf %31, %32 : vector<48x128xf32>
    %34 = vector.extract_strided_slice %33 {offsets = [2, 0], sizes = [46, 128], strides = [1, 1]} : vector<48x128xf32> to vector<46x128xf32>
    %35 = vector.extract_strided_slice %33 {offsets = [0, 0], sizes = [2, 128], strides = [1, 1]} : vector<48x128xf32> to vector<2x128xf32>
    %36 = tpu.concatenate %34, %35 in 0 : vector<46x128xf32>, vector<2x128xf32> -> vector<48x128xf32>
    %37 = arith.maximumf %33, %36 : vector<48x128xf32>
    %38 = arith.truncf %37 : vector<48x128xf32> to vector<48x128xbf16>
    %39 = vector.extract_strided_slice %38 {offsets = [0, 0], sizes = [32, 128], strides = [1, 1]} : vector<48x128xbf16> to vector<32x128xbf16>
    %c0_20 = arith.constant 0 : index
    %c0_21 = arith.constant 0 : index
    %c0_22 = arith.constant 0 : index
    %40 = vector.load %arg4[%c0_20, %c0_21, %c0_22] : memref<5x128x128xbf16, #tpu.memory_space<vmem>>, vector<1x128x128xbf16>
    %41 = vector.shape_cast %40 : vector<1x128x128xbf16> to vector<128x128xbf16>
    %cst_23 = arith.constant dense<0.000000e+00> : vector<32x128xf32>
    %42 = tpu.matmul %39, %41, %cst_23 {dimension_numbers = #tpu.dot_dimension_numbers<[1], [0], [0], [1], [0, 0, 1, 1], [], []>} : vector<32x128xbf16>, vector<128x128xbf16>, vector<32x128xf32> -> vector<32x128xf32>
    %43 = vector.extract_strided_slice %38 {offsets = [4, 0], sizes = [32, 128], strides = [1, 1]} : vector<48x128xbf16> to vector<32x128xbf16>
    %c1_24 = arith.constant 1 : index
    %c0_25 = arith.constant 0 : index
    %c0_26 = arith.constant 0 : index
    %44 = vector.load %arg4[%c1_24, %c0_25, %c0_26] : memref<5x128x128xbf16, #tpu.memory_space<vmem>>, vector<1x128x128xbf16>
    %45 = vector.shape_cast %44 : vector<1x128x128xbf16> to vector<128x128xbf16>
    %cst_27 = arith.constant dense<0.000000e+00> : vector<32x128xf32>
    %46 = tpu.matmul %43, %45, %cst_27 {dimension_numbers = #tpu.dot_dimension_numbers<[1], [0], [0], [1], [0, 0, 1, 1], [], []>} : vector<32x128xbf16>, vector<128x128xbf16>, vector<32x128xf32> -> vector<32x128xf32>
    %47 = arith.addf %42, %46 : vector<32x128xf32>
    %48 = vector.extract_strided_slice %38 {offsets = [8, 0], sizes = [32, 128], strides = [1, 1]} : vector<48x128xbf16> to vector<32x128xbf16>
    %c2_28 = arith.constant 2 : index
    %c0_29 = arith.constant 0 : index
    %c0_30 = arith.constant 0 : index
    %49 = vector.load %arg4[%c2_28, %c0_29, %c0_30] : memref<5x128x128xbf16, #tpu.memory_space<vmem>>, vector<1x128x128xbf16>
    %50 = vector.shape_cast %49 : vector<1x128x128xbf16> to vector<128x128xbf16>
    %cst_31 = arith.constant dense<0.000000e+00> : vector<32x128xf32>
    %51 = tpu.matmul %48, %50, %cst_31 {dimension_numbers = #tpu.dot_dimension_numbers<[1], [0], [0], [1], [0, 0, 1, 1], [], []>} : vector<32x128xbf16>, vector<128x128xbf16>, vector<32x128xf32> -> vector<32x128xf32>
    %52 = arith.addf %47, %51 : vector<32x128xf32>
    %53 = vector.extract_strided_slice %38 {offsets = [12, 0], sizes = [32, 128], strides = [1, 1]} : vector<48x128xbf16> to vector<32x128xbf16>
    %c3_32 = arith.constant 3 : index
    %c0_33 = arith.constant 0 : index
    %c0_34 = arith.constant 0 : index
    %54 = vector.load %arg4[%c3_32, %c0_33, %c0_34] : memref<5x128x128xbf16, #tpu.memory_space<vmem>>, vector<1x128x128xbf16>
    %55 = vector.shape_cast %54 : vector<1x128x128xbf16> to vector<128x128xbf16>
    %cst_35 = arith.constant dense<0.000000e+00> : vector<32x128xf32>
    %56 = tpu.matmul %53, %55, %cst_35 {dimension_numbers = #tpu.dot_dimension_numbers<[1], [0], [0], [1], [0, 0, 1, 1], [], []>} : vector<32x128xbf16>, vector<128x128xbf16>, vector<32x128xf32> -> vector<32x128xf32>
    %57 = arith.addf %52, %56 : vector<32x128xf32>
    %58 = vector.extract_strided_slice %38 {offsets = [16, 0], sizes = [32, 128], strides = [1, 1]} : vector<48x128xbf16> to vector<32x128xbf16>
    %c4_36 = arith.constant 4 : index
    %c0_37 = arith.constant 0 : index
    %c0_38 = arith.constant 0 : index
    %59 = vector.load %arg4[%c4_36, %c0_37, %c0_38] : memref<5x128x128xbf16, #tpu.memory_space<vmem>>, vector<1x128x128xbf16>
    %60 = vector.shape_cast %59 : vector<1x128x128xbf16> to vector<128x128xbf16>
    %cst_39 = arith.constant dense<0.000000e+00> : vector<32x128xf32>
    %61 = tpu.matmul %58, %60, %cst_39 {dimension_numbers = #tpu.dot_dimension_numbers<[1], [0], [0], [1], [0, 0, 1, 1], [], []>} : vector<32x128xbf16>, vector<128x128xbf16>, vector<32x128xf32> -> vector<32x128xf32>
    %62 = arith.addf %57, %61 : vector<32x128xf32>
    %c0_40 = arith.constant 0 : index
    %c0_41 = arith.constant 0 : index
    %63 = vector.load %arg5[%c0_40, %c0_41] : memref<1x128xf32, #tpu.memory_space<vmem>>, vector<1x128xf32>
    %64 = vector.broadcast %63 : vector<1x128xf32> to vector<32x128xf32>
    %65 = arith.addf %62, %64 : vector<32x128xf32>
    %cst_42 = arith.constant 0.000000e+00 : f32
    %66 = vector.broadcast %cst_42 : f32 to vector<32x128xf32>
    %67 = arith.maximumf %65, %66 : vector<32x128xf32>
    %c64_i32 = arith.constant 64 : i32
    %68 = tpu.dynamic_rotate %67 by %c64_i32 dim 1 : vector<32x128xf32>, i32 -> vector<32x128xf32>
    %69 = arith.maximumf %67, %68 : vector<32x128xf32>
    %70 = vector.extract_strided_slice %69 {offsets = [0, 0], sizes = [32, 64], strides = [1, 1]} : vector<32x128xf32> to vector<32x64xf32>
    %71 = vector.extract_strided_slice %70 {offsets = [4, 0], sizes = [28, 64], strides = [1, 1]} : vector<32x64xf32> to vector<28x64xf32>
    %72 = vector.extract_strided_slice %70 {offsets = [0, 0], sizes = [4, 64], strides = [1, 1]} : vector<32x64xf32> to vector<4x64xf32>
    %73 = tpu.concatenate %71, %72 in 0 : vector<28x64xf32>, vector<4x64xf32> -> vector<32x64xf32>
    %74 = arith.maximumf %70, %73 : vector<32x64xf32>
    %75 = arith.truncf %74 : vector<32x64xf32> to vector<32x64xbf16>
    %76 = vector.extract_strided_slice %75 {offsets = [0, 0], sizes = [2, 64], strides = [1, 1]} : vector<32x64xbf16> to vector<2x64xbf16>
    %c0_43 = arith.constant 0 : index
    %c0_44 = arith.constant 0 : index
    %c0_45 = arith.constant 0 : index
    %77 = vector.load %arg6[%c0_43, %c0_44, %c0_45] : memref<4x64x120xbf16, #tpu.memory_space<vmem>>, vector<1x64x120xbf16>
    %78 = vector.shape_cast %77 : vector<1x64x120xbf16> to vector<64x120xbf16>
    %cst_46 = arith.constant dense<0.000000e+00> : vector<2x120xf32>
    %79 = tpu.matmul %76, %78, %cst_46 {dimension_numbers = #tpu.dot_dimension_numbers<[1], [0], [0], [1], [0, 0, 1, 1], [], []>} : vector<2x64xbf16>, vector<64x120xbf16>, vector<2x120xf32> -> vector<2x120xf32>
    %80 = vector.extract_strided_slice %75 {offsets = [8, 0], sizes = [2, 64], strides = [1, 1]} : vector<32x64xbf16> to vector<2x64xbf16>
    %c1_47 = arith.constant 1 : index
    %c0_48 = arith.constant 0 : index
    %c0_49 = arith.constant 0 : index
    %81 = vector.load %arg6[%c1_47, %c0_48, %c0_49] : memref<4x64x120xbf16, #tpu.memory_space<vmem>>, vector<1x64x120xbf16>
    %82 = vector.shape_cast %81 : vector<1x64x120xbf16> to vector<64x120xbf16>
    %cst_50 = arith.constant dense<0.000000e+00> : vector<2x120xf32>
    %83 = tpu.matmul %80, %82, %cst_50 {dimension_numbers = #tpu.dot_dimension_numbers<[1], [0], [0], [1], [0, 0, 1, 1], [], []>} : vector<2x64xbf16>, vector<64x120xbf16>, vector<2x120xf32> -> vector<2x120xf32>
    %84 = arith.addf %79, %83 : vector<2x120xf32>
    %85 = vector.extract_strided_slice %75 {offsets = [16, 0], sizes = [2, 64], strides = [1, 1]} : vector<32x64xbf16> to vector<2x64xbf16>
    %c2_51 = arith.constant 2 : index
    %c0_52 = arith.constant 0 : index
    %c0_53 = arith.constant 0 : index
    %86 = vector.load %arg6[%c2_51, %c0_52, %c0_53] : memref<4x64x120xbf16, #tpu.memory_space<vmem>>, vector<1x64x120xbf16>
    %87 = vector.shape_cast %86 : vector<1x64x120xbf16> to vector<64x120xbf16>
    %cst_54 = arith.constant dense<0.000000e+00> : vector<2x120xf32>
    %88 = tpu.matmul %85, %87, %cst_54 {dimension_numbers = #tpu.dot_dimension_numbers<[1], [0], [0], [1], [0, 0, 1, 1], [], []>} : vector<2x64xbf16>, vector<64x120xbf16>, vector<2x120xf32> -> vector<2x120xf32>
    %89 = arith.addf %84, %88 : vector<2x120xf32>
    %90 = vector.extract_strided_slice %75 {offsets = [24, 0], sizes = [2, 64], strides = [1, 1]} : vector<32x64xbf16> to vector<2x64xbf16>
    %c3_55 = arith.constant 3 : index
    %c0_56 = arith.constant 0 : index
    %c0_57 = arith.constant 0 : index
    %91 = vector.load %arg6[%c3_55, %c0_56, %c0_57] : memref<4x64x120xbf16, #tpu.memory_space<vmem>>, vector<1x64x120xbf16>
    %92 = vector.shape_cast %91 : vector<1x64x120xbf16> to vector<64x120xbf16>
    %cst_58 = arith.constant dense<0.000000e+00> : vector<2x120xf32>
    %93 = tpu.matmul %90, %92, %cst_58 {dimension_numbers = #tpu.dot_dimension_numbers<[1], [0], [0], [1], [0, 0, 1, 1], [], []>} : vector<2x64xbf16>, vector<64x120xbf16>, vector<2x120xf32> -> vector<2x120xf32>
    %94 = arith.addf %89, %93 : vector<2x120xf32>
    %c0_59 = arith.constant 0 : index
    %c0_60 = arith.constant 0 : index
    %95 = vector.load %arg7[%c0_59, %c0_60] : memref<1x120xf32, #tpu.memory_space<vmem>>, vector<1x120xf32>
    %96 = vector.broadcast %95 : vector<1x120xf32> to vector<2x120xf32>
    %97 = arith.addf %94, %96 : vector<2x120xf32>
    %cst_61 = arith.constant 0.000000e+00 : f32
    %98 = vector.broadcast %cst_61 : f32 to vector<2x120xf32>
    %99 = arith.maximumf %97, %98 : vector<2x120xf32>
    %100 = arith.truncf %99 : vector<2x120xf32> to vector<2x120xbf16>
    %c0_62 = arith.constant 0 : index
    %c0_63 = arith.constant 0 : index
    %101 = vector.load %arg8[%c0_62, %c0_63] : memref<120x84xbf16, #tpu.memory_space<vmem>>, vector<120x84xbf16>
    %cst_64 = arith.constant dense<0.000000e+00> : vector<2x84xf32>
    %102 = tpu.matmul %100, %101, %cst_64 {dimension_numbers = #tpu.dot_dimension_numbers<[1], [0], [0], [1], [0, 0, 1, 1], [], []>} : vector<2x120xbf16>, vector<120x84xbf16>, vector<2x84xf32> -> vector<2x84xf32>
    %c0_65 = arith.constant 0 : index
    %c0_66 = arith.constant 0 : index
    %103 = vector.load %arg9[%c0_65, %c0_66] : memref<1x84xf32, #tpu.memory_space<vmem>>, vector<1x84xf32>
    %104 = vector.broadcast %103 : vector<1x84xf32> to vector<2x84xf32>
    %105 = arith.addf %102, %104 : vector<2x84xf32>
    %cst_67 = arith.constant 0.000000e+00 : f32
    %106 = vector.broadcast %cst_67 : f32 to vector<2x84xf32>
    %107 = arith.maximumf %105, %106 : vector<2x84xf32>
    %108 = arith.truncf %107 : vector<2x84xf32> to vector<2x84xbf16>
    %c0_68 = arith.constant 0 : index
    %c0_69 = arith.constant 0 : index
    %109 = vector.load %arg10[%c0_68, %c0_69] : memref<84x10xbf16, #tpu.memory_space<vmem>>, vector<84x10xbf16>
    %cst_70 = arith.constant dense<0.000000e+00> : vector<2x10xf32>
    %110 = tpu.matmul %108, %109, %cst_70 {dimension_numbers = #tpu.dot_dimension_numbers<[1], [0], [0], [1], [0, 0, 1, 1], [], []>} : vector<2x84xbf16>, vector<84x10xbf16>, vector<2x10xf32> -> vector<2x10xf32>
    %c0_71 = arith.constant 0 : index
    %c0_72 = arith.constant 0 : index
    %111 = vector.load %arg11[%c0_71, %c0_72] : memref<1x10xf32, #tpu.memory_space<vmem>>, vector<1x10xf32>
    %112 = vector.broadcast %111 : vector<1x10xf32> to vector<2x10xf32>
    %113 = arith.addf %110, %112 : vector<2x10xf32>
    %c0_73 = arith.constant 0 : index
    %c0_74 = arith.constant 0 : index
    %114 = vector.load %arg12[%c0_73, %c0_74] : memref<2x10xf32, #tpu.memory_space<vmem>>, vector<2x10xf32>
    tpu.vector_store %arg12[%c0_73, %c0_74], %113 {strides = array<i32>} : memref<2x10xf32, #tpu.memory_space<vmem>>, vector<2x10xf32>,
    return
  }
  func.func @transform_0(%arg0: i32) -> (i32, i32, i32) {
    %c0_i32 = arith.constant 0 : i32
    %c0_i32_0 = arith.constant 0 : i32
    %c0_i32_1 = arith.constant 0 : i32
    return %arg0, %c0_i32, %c0_i32_0 : i32, i32, i32
  }
  func.func @transform_1(%arg0: i32) -> (i32, i32, i32) {
    %c0_i32 = arith.constant 0 : i32
    %c0_i32_0 = arith.constant 0 : i32
    %c0_i32_1 = arith.constant 0 : i32
    %c0_i32_2 = arith.constant 0 : i32
    return %c0_i32, %c0_i32_0, %c0_i32_1 : i32, i32, i32
  }
  func.func @transform_2(%arg0: i32) -> (i32, i32) {
    %c0_i32 = arith.constant 0 : i32
    %c0_i32_0 = arith.constant 0 : i32
    %c0_i32_1 = arith.constant 0 : i32
    return %c0_i32, %c0_i32_0 : i32, i32
  }
  func.func @transform_3(%arg0: i32) -> (i32, i32, i32) {
    %c0_i32 = arith.constant 0 : i32
    %c0_i32_0 = arith.constant 0 : i32
    %c0_i32_1 = arith.constant 0 : i32
    %c0_i32_2 = arith.constant 0 : i32
    return %c0_i32, %c0_i32_0, %c0_i32_1 : i32, i32, i32
  }
  func.func @transform_4(%arg0: i32) -> (i32, i32) {
    %c0_i32 = arith.constant 0 : i32
    %c0_i32_0 = arith.constant 0 : i32
    %c0_i32_1 = arith.constant 0 : i32
    return %c0_i32, %c0_i32_0 : i32, i32
  }
  func.func @transform_5(%arg0: i32) -> (i32, i32, i32) {
    %c0_i32 = arith.constant 0 : i32
    %c0_i32_0 = arith.constant 0 : i32
    %c0_i32_1 = arith.constant 0 : i32
    %c0_i32_2 = arith.constant 0 : i32
    return %c0_i32, %c0_i32_0, %c0_i32_1 : i32, i32, i32
  }
  func.func @transform_6(%arg0: i32) -> (i32, i32) {
    %c0_i32 = arith.constant 0 : i32
    %c0_i32_0 = arith.constant 0 : i32
    %c0_i32_1 = arith.constant 0 : i32
    return %c0_i32, %c0_i32_0 : i32, i32
  }
  func.func @transform_7(%arg0: i32) -> (i32, i32) {
    %c0_i32 = arith.constant 0 : i32
    %c0_i32_0 = arith.constant 0 : i32
    %c0_i32_1 = arith.constant 0 : i32
    return %c0_i32, %c0_i32_0 : i32, i32
  }
  func.func @transform_8(%arg0: i32) -> (i32, i32) {
    %c0_i32 = arith.constant 0 : i32
    %c0_i32_0 = arith.constant 0 : i32
    %c0_i32_1 = arith.constant 0 : i32
    return %c0_i32, %c0_i32_0 : i32, i32
  }
  func.func @transform_9(%arg0: i32) -> (i32, i32) {
    %c0_i32 = arith.constant 0 : i32
    %c0_i32_0 = arith.constant 0 : i32
    %c0_i32_1 = arith.constant 0 : i32
    return %c0_i32, %c0_i32_0 : i32, i32
  }
  func.func @transform_10(%arg0: i32) -> (i32, i32) {
    %c0_i32 = arith.constant 0 : i32
    %c0_i32_0 = arith.constant 0 : i32
    %c0_i32_1 = arith.constant 0 : i32
    return %c0_i32, %c0_i32_0 : i32, i32
  }
  func.func @transform_11(%arg0: i32) -> (i32, i32) {
    %c0_i32 = arith.constant 0 : i32
    %c0_i32_0 = arith.constant 0 : i32
    return %arg0, %c0_i32 : i32, i32
  }
}

</mosaic_0001>

<bundles_post_ra>
// kernel: lenet_forward.1
= control target key start
LH: loop header
LB: loop body
LE: loop exit
PB: predicated region body
PF: predicated region fallthrough
CT: control target
= control target key end

     0   :  { %16 = vsyncpa [#allocation3], 0  ;;  %s2597_s0 = inlined_call_operand.vmem [shape: bf16[1,56,28], index: 0, kind: input, shape index: {}]   ;;  %s2598_s1 = inlined_call_operand.hbm [shape: bf16[5,28,256], index: 1, kind: input, shape index: {}]   ;;  %s2599_s2 = inlined_call_operand.vmem [shape: f32[1,256], index: 2, kind: input, shape index: {}]   ;;  %s2600_s3 = inlined_call_operand.hbm [shape: bf16[5,128,128], index: 3, kind: input, shape index: {}]   ;;  %s2601_s4 = inlined_call_operand.vmem [shape: f32[1,128], index: 4, kind: input, shape index: {}]   ;;  %s2602_s5 = inlined_call_operand.vmem [shape: bf16[4,64,120], index: 5, kind: input, shape index: {}]   ;;  %s2603_s6 = inlined_call_operand.vmem [shape: f32[1,120], index: 6, kind: input, shape index: {}]   ;;  %s2604_s7 = inlined_call_operand.vmem [shape: bf16[120,84], index: 7, kind: input, shape index: {}]   ;;  %s2605_s8 = inlined_call_operand.vmem [shape: f32[1,84], index: 8, kind: input, shape index: {}]   ;;  %s2606_s9 = inlined_call_operand.vmem [shape: bf16[84,10], index: 9, kind: input, shape index: {}]   ;;  %s2607_s10 = inlined_call_operand.vmem [shape: f32[1,10], index: 10, kind: input, shape index: {}]   ;;  %s2608_s11 = inlined_call_operand.hbm [shape: f32[2,10], index: 11, kind: output, shape index: {}]  }
   0x1   :  { %17 = vsyncpa [#allocation6], 0 }
   0x2   :  { %18 = vsyncpa [#allocation4], 0  ;;  %s25_s19 = sshll.u32 %s2598_s1, 4  ;;  %s2190_s20 = smov [#allocation2]   ;;  %s26_s19 = int_to_ptr.hbm [resolvable:$true] %s25_s19 }
   0x3   :  { %s27_s21 = sshll.u32 %s2190_s20, 4  ;;  %s40_s24 = sshll.u32 %s2600_s3, 4  ;;  %s28_s21 = int_to_ptr.vmem [resolvable:$true] %s27_s21  ;;  %s41_s24 = int_to_ptr.hbm [resolvable:$true] %s40_s24 }
   0x4   :  { %s2191_s25 = smov 128   ;;  %s2192_s26 = smov 8  }
   0x5   :  { %33 = dma.hbm_to_vmem [thread:$0]  %s26_s19, 2560, %s28_s21, [#allocation3], %s2191_s25, %s2191_s25, %s2192_s26  }
   0x6   :  { %s2193_s27 = smov [#allocation5]   ;;  %s2194_s29 = smov 64  }
   0x7   :  { %s42_s28 = sshll.u32 %s2193_s27, 4  ;;  %s2195_s30 = smov 4   ;;  %s43_s28 = int_to_ptr.vmem [resolvable:$true] %s42_s28 }
   0x8   :  { %48 = dma.hbm_to_vmem [thread:$0]  %s41_s24, 5120, %s43_s28, [#allocation6], %s2194_s29, %s2194_s29, %s2195_s30  }
   0x9   :  { %2184 = dma.done.wait [#allocation3], 2560  }
   0xa   :  { %2185 = vsyncadd [#allocation3], 4294964736 }
   0xb   :  { %2186 = dma.done.wait [#allocation6], 5120  }
   0xc   :  { %2187 = vsyncadd [#allocation6], 4294962176  ;;  %vm142_vm0 = vcmask 1045504   ;;  %vm106_vm1 = vcmask 1046528   ;;  %v1573_v0 = vld [vmem:[#allocation2 + $0x30] sm:$0xf] }
   0xd   :  { %v1982_v1 = vld [vmem:[#allocation2 + $0x34] sm:$0x30]  ;;  %v1981_v2 = vld [vmem:[#allocation2 + $0x34] sm:$0xf]  ;;  %v1575_v4 = vld [vmem:[#allocation2 + $0x38] sm:$0x30] }
   0xe   :  { %v1574_v3 = vor.u32 %v1982_v1, %v1573_v0  ;;  %v1595_v5 = vld [vmem:[#allocation2 + $0x10] sm:$0xf]  ;;  %v1978_v6 = vld [vmem:[#allocation2 + $0x14] sm:$0x30]  ;;  %v1578_v7 = vor.u32 %v1981_v2, %v1575_v4  ;;  %v1977_v9 = vld [vmem:[#allocation2 + $0x14] sm:$0xf] }
   0xf   :  { %v1596_v8 = vor.u32 %v1978_v6, %v1595_v5  ;;  %v1597_v10 = vld [vmem:[#allocation2 + $0x18] sm:$0x30]  ;;  %v1565_v11 = vld [vmem:[#allocation2 + $0x20] sm:$0xf]  ;;  %v1980_v14 = vld [vmem:[#allocation2 + $0x24] sm:$0xf0] }
  0x10   :  { %v144_v12 = vsel %vm142_vm0, %v1574_v3, 0  ;;  %v1600_v13 = vor.u32 %v1977_v9, %v1597_v10  ;;  %v1979_v15 = vld [vmem:[#allocation2 + $0x24] sm:$0xf]  ;;  %v147_v17 = vsel %vm142_vm0, %v1578_v7, 0  ;;  %v1566_v19 = vor.u32 %v1980_v14, %v1565_v11  ;;  %v1567_v20 = vld [vmem:[#allocation2 + $0x28] sm:$0xf0] }
  0x11   :  { %v2269_v16 = vld [vmem:[%s2597_s0] sm:$0xff]   ;;  %155 = vmatpush.bf16.msra.mxu0 %v144_v12  ;;  %v225_v18 = vsel %vm142_vm0, %v1596_v8, 0  ;;  %179 = vmatpush.bf16.msra.mxu1 %v147_v17  ;;  %v1570_v23 = vor.u32 %v1979_v15, %v1567_v20  ;;  %v1976_v24 = vld [vmem:[#allocation2 + $0x4] sm:$0xf0]  ;;  %v1589_v28 = vld [vmem:[#allocation2 + $0x8] sm:$0xf0] }
  0x12   :  { %v1587_v21 = vld [vmem:[#allocation2] sm:$0xf]  ;;  %236 = vmatpush.bf16.msra.mxu2 %v225_v18  ;;  %v228_v22 = vsel %vm142_vm0, %v1600_v13, 0  ;;  %v1975_v25 = vld [vmem:[#allocation2 + $0x4] sm:$0xf]  ;;  %v2277_v26 = vld [vmem:[%s2597_s0 + $0x8] sm:$0xff]  }
  0x13   :  { %260 = vmatpush.bf16.msra.mxu3 %v228_v22  ;;  %v1588_v27 = vor.u32 %v1976_v24, %v1587_v21  ;;  %v107_v29 = vrot.slane %v2269_v16, 1  ;;  %v108_v30 = vrot.slane %v2277_v26, 1  ;;  %v1617_v31 = vld [vmem:[#allocation2 + $0x50] sm:$0xf]  ;;  %v1592_v32 = vor.u32 %v1975_v25, %v1589_v28  ;;  %v1986_v33 = vld [vmem:[#allocation2 + $0x54] sm:$0x30] }
  0x14   :  { %v1985_v34 = vld [vmem:[#allocation2 + $0x54] sm:$0xf]  ;;  %v1619_v35 = vld [vmem:[#allocation2 + $0x58] sm:$0x30]  ;;  %vm132_vm2 = vcmask 228352   ;;  %v1618_v37 = vor.u32 %v1986_v33, %v1617_v31  ;;  %v284_v20 = vrot.slane %v2269_v16, 2 }
  0x15   :  { %156 = vmatpush.bf16.msra.mxu0 %v1566_v19  ;;  %v109_v36 = vsel %vm106_vm1, %v107_v29, %v108_v30  ;;  %v1622_v38 = vor.u32 %v1985_v34, %v1619_v35  ;;  %180 = vmatpush.bf16.msra.mxu1 %v1570_v23  ;;  %v1609_v39 = vld [vmem:[#allocation2 + $0x40] sm:$0xf]  ;;  %v1983_v40 = vld [vmem:[#allocation2 + $0x44] sm:$0xf]  ;;  %v1611_v41 = vld [vmem:[#allocation2 + $0x48] sm:$0xf0] }
  0x16   :  { %237 = vmatpush.bf16.msra.mxu2 %v1588_v27  ;;  %v319_v42 = vsel %vm142_vm0, %v1618_v37, 0  ;;  %v1984_v44 = vld [vmem:[#allocation2 + $0x44] sm:$0xf0]  ;;  %v1614_v45 = vor.u32 %v1983_v40, %v1611_v41  ;;  %v1639_v47 = vld [vmem:[#allocation2 + $0x70] sm:$0xf]  ;;  %v285_v21 = vrot.slane %v2277_v26, 2 }
  0x17   :  { %261 = vmatpush.bf16.msra.mxu3 %v1592_v32  ;;  %v322_v43 = vsel %vm142_vm0, %v1622_v38, 0  ;;  %v1610_v46 = vor.u32 %v1984_v44, %v1609_v39  ;;  %v1990_v48 = vld [vmem:[#allocation2 + $0x74] sm:$0x30]  ;;  %v1989_v49 = vld [vmem:[#allocation2 + $0x74] sm:$0xf]  ;;  %v390_v22 = vrot.slane %v2269_v16, 3 }
  0x18   :  { %1579 = vmatmul.msk.bf16.vlgmr.msra.gmra.mxu0 %vm132_vm2, %v109_v36  ;;  %1582 = vmatmul.msk.bf16.vlgmr.msra.gmra.mxu1 %vm132_vm2, %v109_v36  ;;  %v1640_v50 = vor.u32 %v1990_v48, %v1639_v47  ;;  %v1641_v51 = vld [vmem:[#allocation2 + $0x78] sm:$0x30]  ;;  %v1631_v52 = vld [vmem:[#allocation2 + $0x60] sm:$0xf]  ;;  %v1988_v53 = vld [vmem:[#allocation2 + $0x64] sm:$0xf0]  ;;  %v286_v24 = vsel %vm142_vm0, %v284_v20, %v285_v21 }
  0x19   :  { %354 = vmatpush.bf16.msrb.mxu1 %v322_v43  ;;  %1601 = vmatmul.msk.bf16.vlgmr.msra.gmra.mxu2 %vm132_vm2, %v2269_v16  ;;  %v1644_v54 = vor.u32 %v1989_v49, %v1641_v51  ;;  %v1987_v55 = vld [vmem:[#allocation2 + $0x64] sm:$0xf]  ;;  %v1633_v56 = vld [vmem:[#allocation2 + $0x68] sm:$0xf0]  ;;  %v2294_v58 = vld [vmem:[%s2597_s0 + $0x10] sm:$0xff]   ;;  %v1632_v60 = vor.u32 %v1988_v53, %v1631_v52  ;;  %v391_v23 = vrot.slane %v2277_v26, 3 }
  0x1a   :  { %1604 = vmatmul.msk.bf16.vlgmr.msra.gmra.mxu3 %vm132_vm2, %v2269_v16  ;;  %330 = vmatpush.bf16.msrb.mxu0 %v319_v42  ;;  %v425_v57 = vsel %vm142_vm0, %v1640_v50, 0  ;;  %v1636_v61 = vor.u32 %v1987_v55, %v1633_v56  ;;  %v110_v62 = vrot.slane %v2294_v58, 1  ;;  %v78_v0 = vld [vmem:[%s2597_s0 + $0x18] sm:$0xf]  ;;  %v1661_v2 = vld [vmem:[#allocation2 + $0x90] sm:$0xf]  ;;  %v2074_v35 = vunpack.c.h.b16 %v2294_v58 }
  0x1b   :  { %436 = vmatpush.bf16.msrb.mxu2 %v425_v57  ;;  %v428_v59 = vsel %vm142_vm0, %v1644_v54, 0  ;;  %v101_v1 = vunpack.c.l.b16 %v78_v0  ;;  %v1994_v3 = vld [vmem:[#allocation2 + $0x94] sm:$0x30]  ;;  %v1993_v4 = vld [vmem:[#allocation2 + $0x94] sm:$0xf]  ;;  %vm389_vm3 = vcmask 1044480  }
  0x1c   :  { %460 = vmatpush.bf16.msrb.mxu3 %v428_v59  ;;  %v111_v63 = vsel %vm106_vm1, %v108_v30, %v110_v62  ;;  %v1662_v5 = vor.u32 %v1994_v3, %v1661_v2  ;;  %v1663_v6 = vld [vmem:[#allocation2 + $0x98] sm:$0x30]  ;;  %v1653_v13 = vld [vmem:[#allocation2 + $0x80] sm:$0xf]  ;;  %v1992_v14 = vld [vmem:[#allocation2 + $0x84] sm:$0xf0]  ;;  %v392_v25 = vsel %vm389_vm3, %v390_v22, %v391_v23 }
  0x1d   :  { %355 = vmatpush.bf16.msrb.mxu1 %v1614_v45  ;;  %v1666_v7 = vor.u32 %v1993_v4, %v1663_v6  ;;  %v105_v8 = vpack.c.b16 %v101_v1, %v101_v1  ;;  %v1991_v15 = vld [vmem:[#allocation2 + $0x84] sm:$0xf]  ;;  %v1654_v17 = vor.u32 %v1992_v14, %v1653_v13  ;;  %v1655_v18 = vld [vmem:[#allocation2 + $0x88] sm:$0xf0]  ;;  %v287_v27 = vrot.slane %v2294_v58, 2  ;;  %v2001_v6 = vld [vmem:[#allocation5 + $0x30] sm:$0xff] }
  0x1e   :  { %331 = vmatpush.bf16.msrb.mxu0 %v1610_v46  ;;  %v526_v9 = vsel %vm142_vm0, %v1662_v5, 0  ;;  %v1658_v19 = vor.u32 %v1991_v15, %v1655_v18  ;;  %v393_v28 = vrot.slane %v2294_v58, 3  ;;  %v2089_v33 = vld [vmem:[%s2597_s0 + $0x4] sm:$0xff]   ;;  %v2090_v34 = vld [vmem:[%s2597_s0 + $0xc] sm:$0xff]   ;;  %v497_v36 = vpack.c.b16 %v101_v1, %v2074_v35  ;;  %v2002_v1 = vld [vmem:[#allocation5 + $0x38] sm:$0xff]  ;;  %s2196_s17 = smov [#allocation7]  }
  0x1f   :  { %437 = vmatpush.bf16.msrb.mxu2 %v1632_v60  ;;  %v529_v10 = vsel %vm142_vm0, %v1666_v7, 0  ;;  %v112_v11 = vrot.slane %v105_v8, 1  ;;  %v288_v16 = vsel %vm142_vm0, %v285_v21, %v287_v27  ;;  %v289_v29 = vrot.slane %v105_v8, 2  ;;  %v2010_v7 = vld [vmem:[#allocation5 + $0x78] sm:$0xff]  ;;  %v2009_v13 = vld [vmem:[#allocation5 + $0x70] sm:$0xff]  ;;  %v2008_v22 = vld [vmem:[#allocation5 + $0x68] sm:$0xff] }
  0x20   :  { %461 = vmatpush.bf16.msrb.mxu3 %v1636_v61  ;;  %v395_v30 = vrot.slane %v105_v8, 3  ;;  %v2000_v8 = vld [vmem:[#allocation5 + $0x28] sm:$0xff]  ;;  %v1998_v15 = vld [vmem:[#allocation5 + $0x18] sm:$0xff]  ;;  %v1997_v20 = vld [vmem:[#allocation5 + $0x10] sm:$0xff]  ;;  %vm1161_vm4 = vcmask 1043456   ;;  %vm1224_vm5 = vcmask 523264  }
  0x21   :  { %561 = vmatpush.bf16.msra.mxu1 %v529_v10  ;;  %v113_v12 = vsel %vm106_vm1, %v110_v62, %v112_v11  ;;  %v290_v31 = vsel %vm142_vm0, %v287_v27, %v289_v29  ;;  %v1999_v11 = vld [vmem:[#allocation5 + $0x20] sm:$0xff]  ;;  %v2033_v21 = vld [vmem:[#allocation5 + $0x130] sm:$0xff]  ;;  %v2032_v29 = vld [vmem:[#allocation5 + $0x128] sm:$0xff]  ;;  %vm1526_vm6 = vcmask 1041408   ;;  %vm1452_vm7 = vcmask 982016   ;;  %s1550_s18 = sshll.u32 %s2196_s17, 4  ;;  %s1551_s18 = int_to_ptr.vmem [resolvable:$true] %s1550_s18 }
  0x22   :  { %537 = vmatpush.bf16.msra.mxu0 %v526_v9  ;;  %v396_v32 = vsel %vm389_vm3, %v393_v28, %v395_v30  ;;  %v591_v27 = vld [vmem:[%s2599_s2] sm:$0x3]  ;;  %vm1522_vm8 = vcmask 687104   ;;  %s1552_s20 = sshll.u32 %s2608_s11, 4  ;;  %vm1543_vm9 = vcmask 74752   ;;  %s1553_s20 = int_to_ptr.hbm [resolvable:$true] %s1552_s20 }
  0x23   :  { %765 = vmatpush.bf16.msra.mxu2 %v2010_v7  ;;  %v2419_v35 = vperm.slane %v591_v27, 1 }
  0x24   :  { %834 = vmatpush.bf16.msra.mxu3 %v2002_v1  ;;  %v2007_v1 = vld [vmem:[#allocation5 + $0x60] sm:$0xff] }
  0x25   :  { %562 = vmatpush.bf16.msra.mxu1 %v1658_v19 }
  0x26   :  { %538 = vmatpush.bf16.msra.mxu0 %v1654_v17  ;;  %v2034_v17 = vld [vmem:[#allocation5 + $0x138] sm:$0xff] }
  0x27   :  { %766 = vmatpush.bf16.msra.mxu2 %v2009_v13  ;;  %v2026_v13 = vld [vmem:[#allocation5 + $0xf8] sm:$0xff] }
  0x28   :  { %1580 = vmatmul.msk.bf16.gmra.mxu0 %vm132_vm2, %v111_v63  ;;  %1583 = vmatmul.msk.bf16.gmra.mxu1 %vm132_vm2, %v111_v63 }
  0x29   :  { %1602 = vmatmul.msk.bf16.gmra.mxu2 %vm132_vm2, %v2277_v26  ;;  %835 = vmatpush.bf16.msra.mxu3 %v2001_v6 }
  0x2a   :  { %1605 = vmatmul.msk.bf16.gmra.mxu3 %vm132_vm2, %v2277_v26  ;;  %v394_v26 = vsel %vm389_vm3, %v391_v23, %v393_v28 }
  0x2b   :  { %767 = vmatpush.bf16.msra.mxu2 %v2008_v22 }
  0x2d   :  { %836 = vmatpush.bf16.msra.mxu3 %v2000_v8  ;;  %v2006_v8 = vld [vmem:[#allocation5 + $0x58] sm:$0xff] }
  0x2f   :  { %768 = vmatpush.bf16.msra.mxu2 %v2007_v1 }
  0x31   :  { %837 = vmatpush.bf16.msra.mxu3 %v1999_v11 }
  0x33   :  { %769 = vmatpush.bf16.msra.mxu2 %v2006_v8 }
  0x35   :  { %838 = vmatpush.bf16.msra.mxu3 %v1998_v15 }
  0x38   :  { %1581 = vmatmul.msk.bf16.gmra.mxu0 %vm132_vm2, %v113_v12  ;;  %1584 = vmatmul.msk.bf16.gmra.mxu1 %vm132_vm2, %v113_v12 }
  0x39   :  { %1603 = vmatmul.msk.bf16.gmra.mxu2 %vm132_vm2, %v2294_v58  ;;  %839 = vmatpush.bf16.msra.mxu3 %v1997_v20 }
  0x3a   :  { %1606 = vmatmul.msk.bf16.gmra.mxu3 %vm132_vm2, %v2294_v58 }
  0x48   :  { %1623 = vmatmul.msk.bf16.vlgmr.msrb.gmra.mxu0 %vm132_vm2, %v286_v24  ;;  %1626 = vmatmul.msk.bf16.vlgmr.msrb.gmra.mxu1 %vm132_vm2, %v286_v24 }
  0x49   :  { %1645 = vmatmul.msk.bf16.vlgmr.msrb.gmra.mxu2 %vm132_vm2, %v392_v25  ;;  %1110 = vmatpush.bf16.msrb.mxu0 %v2034_v17 }
  0x4a   :  { %1648 = vmatmul.msk.bf16.vlgmr.msrb.gmra.mxu3 %vm132_vm2, %v392_v25 }
  0x4d   :  { %1111 = vmatpush.bf16.msrb.mxu0 %v2033_v21 }
  0x51   :  { %1112 = vmatpush.bf16.msrb.mxu0 %v2032_v29 }
  0x58   :  { %1624 = vmatmul.msk.bf16.gmra.mxu0 %vm132_vm2, %v288_v16  ;;  %1627 = vmatmul.msk.bf16.gmra.mxu1 %vm132_vm2, %v288_v16 }
  0x59   :  { %1646 = vmatmul.msk.bf16.gmra.mxu2 %vm132_vm2, %v394_v26 }
  0x5a   :  { %1649 = vmatmul.msk.bf16.gmra.mxu3 %vm132_vm2, %v394_v26  ;;  %v1996_v26 = vld [vmem:[#allocation5 + $0x8] sm:$0xff] }
  0x5b   :  { %840 = vmatpush.bf16.msra.mxu3 %v1996_v26 }
  0x68   :  { %1625 = vmatmul.msk.bf16.gmra.mxu0 %vm132_vm2, %v290_v31  ;;  %1628 = vmatmul.msk.bf16.gmra.mxu1 %vm132_vm2, %v290_v31 }
  0x69   :  { %1647 = vmatmul.msk.bf16.gmra.mxu2 %vm132_vm2, %v396_v32 }
  0x6a   :  { %1650 = vmatmul.msk.bf16.gmra.mxu3 %vm132_vm2, %v396_v32  ;;  %v2417_v32 = vperm.slane %v591_v27, 0 }
  0x78   :  { %1667 = vmatmul.msk.bf16.vlgmr.msra.gmra.mxu0 %vm132_vm2, %v2089_v33  ;;  %1670 = vmatmul.msk.bf16.vlgmr.msra.gmra.mxu1 %vm132_vm2, %v2089_v33 }
  0x88   :  { %1668 = vmatmul.msk.bf16.gmra.mxu0 %vm132_vm2, %v2090_v34  ;;  %1671 = vmatmul.msk.bf16.gmra.mxu1 %vm132_vm2, %v2090_v34 }
  0x95   :  { %v158_v37 = vpop.f32.mrf.mxu0  ;;  %v182_v38 = vpop.f32.mrf.mxu1 }
  0x98   :  { %1669 = vmatmul.msk.bf16.gmra.mxu0 %vm132_vm2, %v497_v36  ;;  %1672 = vmatmul.msk.bf16.gmra.mxu1 %vm132_vm2, %v497_v36 }
  0x9c   :  { %v239_v43 = vpop.f32.mrf.mxu2 }
  0x9d   :  { %v2354_v39 = vpop.f32.mrf.mxu0  ;;  %v2356_v40 = vpop.f32.mrf.mxu1  ;;  %v240_v23 = vadd.f32 %v239_v43, %v158_v37  ;;  %v2031_v43 = vld [vmem:[#allocation5 + $0x120] sm:$0xff] }
  0x9e   :  { %v263_v44 = vpop.f32.mrf.mxu3  ;;  %1113 = vmatpush.bf16.msrb.mxu0 %v2031_v43 }
  0x9f   :  { %v264_v24 = vadd.f32 %v263_v44, %v182_v38  ;;  %v1995_v38 = vld [vmem:[#allocation5] sm:$0xff] }
  0xa0   :  { %841 = vmatpush.bf16.msra.mxu3 %v1995_v38 }
  0xa4   :  { %v2366_v47 = vpop.f32.mrf.mxu2  ;;  %1020 = vmatpush.bf16.msrb.mxu3 %v2026_v13 }
  0xa5   :  { %v2358_v41 = vpop.f32.mrf.mxu0  ;;  %v2360_v42 = vpop.f32.mrf.mxu1 }
  0xa6   :  { %v2370_v49 = vpop.f32.mrf.mxu3 }
  0xa7   :  { %v266_v6 = vadd.f32 %v2370_v49, %v2356_v40 }
  0xac   :  { %v2378_v53 = vpop.f32.mrf.mxu2 }
  0xad   :  { %v2362_v45 = vpop.f32.mrf.mxu0  ;;  %v2364_v46 = vpop.f32.mrf.mxu1 }
  0xae   :  { %v2380_v54 = vpop.f32.mrf.mxu3 }
  0xb4   :  { %v2382_v57 = vpop.f32.mrf.mxu2 }
  0xb5   :  { %v2368_v48 = vpop.f32.mrf.mxu0  ;;  %v2372_v50 = vpop.f32.mrf.mxu1 }
  0xb6   :  { %v2384_v58 = vpop.f32.mrf.mxu3 }
  0xbc   :  { %v2390_v61 = vpop.f32.mrf.mxu2 }
  0xbd   :  { %v2374_v51 = vpop.f32.mrf.mxu0  ;;  %v2376_v52 = vpop.f32.mrf.mxu1 }
  0xbe   :  { %v2392_v62 = vpop.f32.mrf.mxu3 }
  0xc4   :  { %v2398_v2 = vpop.f32.mrf.mxu2 }
  0xc5   :  { %v333_v55 = vpop.f32.mrf.mxu0  ;;  %v357_v56 = vpop.f32.mrf.mxu1 }
  0xc6   :  { %v2402_v4 = vpop.f32.mrf.mxu3  ;;  %v372_v28 = vadd.f32 %v333_v55, %v240_v23  ;;  %v373_v30 = vadd.f32 %v357_v56, %v264_v24  ;;  %v242_v55 = vadd.f32 %v2366_v47, %v2354_v39  ;;  %v2025_v24 = vld [vmem:[#allocation5 + $0xf0] sm:$0xff] }
  0xc7   :  { %1021 = vmatpush.bf16.msrb.mxu3 %v2025_v24  ;;  %v2021_v24 = vld [vmem:[#allocation5 + $0xd0] sm:$0xff] }
  0xcc   :  { %v439_v12 = vpop.f32.mrf.mxu2 }
  0xcd   :  { %v2386_v59 = vpop.f32.mrf.mxu0  ;;  %v2388_v60 = vpop.f32.mrf.mxu1  ;;  %v478_v31 = vadd.f32 %v439_v12, %v372_v28  ;;  %v2005_v28 = vld [vmem:[#allocation5 + $0x50] sm:$0xff] }
  0xce   :  { %v463_v14 = vpop.f32.mrf.mxu3  ;;  %v374_v11 = vadd.f32 %v2386_v59, %v242_v55  ;;  %v375_v15 = vadd.f32 %v2388_v60, %v266_v6  ;;  %v2029_v59 = vld [vmem:[#allocation5 + $0x110] sm:$0xff]  ;;  %v245_v60 = vadd.f32 %v2378_v53, %v2358_v41  ;;  %770 = vmatpush.bf16.msra.mxu2 %v2005_v28  ;;  %v2023_v55 = vld [vmem:[#allocation5 + $0xe0] sm:$0xff]  ;;  %v250_v28 = vadd.f32 %v2390_v61, %v2368_v48 }
  0xcf   :  { %v479_v33 = vadd.f32 %v463_v14, %v373_v30  ;;  %v2030_v14 = vld [vmem:[#allocation5 + $0x118] sm:$0xff] }
  0xd0   :  { %1114 = vmatpush.bf16.msrb.mxu0 %v2030_v14  ;;  %v2003_v14 = vld [vmem:[#allocation5 + $0x40] sm:$0xff] }
  0xd4   :  { %v441_v25 = vpop.f32.mrf.mxu2  ;;  %1115 = vmatpush.bf16.msrb.mxu0 %v2029_v59 }
  0xd5   :  { %v2394_v63 = vpop.f32.mrf.mxu0  ;;  %v2396_v0 = vpop.f32.mrf.mxu1  ;;  %v480_v47 = vadd.f32 %v441_v25, %v374_v11  ;;  %v269_v25 = vadd.f32 %v2380_v54, %v2360_v42  ;;  %v271_v11 = vadd.f32 %v2384_v58, %v2364_v46 }
  0xd6   :  { %v465_v16 = vpop.f32.mrf.mxu3  ;;  %v376_v29 = vadd.f32 %v2394_v63, %v245_v60 }
  0xd7   :  { %v481_v21 = vadd.f32 %v465_v16, %v375_v15 }
  0xdc   :  { %v444_v17 = vpop.f32.mrf.mxu2 }
  0xdd   :  { %v2400_v3 = vpop.f32.mrf.mxu0  ;;  %v2404_v5 = vpop.f32.mrf.mxu1 }
  0xde   :  { %v468_v20 = vpop.f32.mrf.mxu3 }
  0xe4   :  { %v446_v53 = vpop.f32.mrf.mxu2 }
  0xe5   :  { %v2406_v9 = vpop.f32.mrf.mxu0  ;;  %v2408_v10 = vpop.f32.mrf.mxu1 }
  0xe6   :  { %v470_v42 = vpop.f32.mrf.mxu3 }
  0xec   :  { %v449_v59 = vpop.f32.mrf.mxu2 }
  0xed   :  { %v2410_v18 = vpop.f32.mrf.mxu0  ;;  %v2412_v19 = vpop.f32.mrf.mxu1 }
  0xee   :  { %v473_v60 = vpop.f32.mrf.mxu3 }
  0xf5   :  { %v540_v34 = vpop.f32.mrf.mxu0  ;;  %v564_v37 = vpop.f32.mrf.mxu1 }
  0xf6   :  { %v579_v36 = vadd.f32 %v540_v34, %v478_v31  ;;  %v580_v44 = vadd.f32 %v564_v37, %v479_v33  ;;  %v2024_v31 = vld [vmem:[#allocation5 + $0xe8] sm:$0xff]  ;;  %v377_v34 = vadd.f32 %v2396_v0, %v269_v25  ;;  %v482_v37 = vadd.f32 %v444_v17, %v376_v29 }
  0xf7   :  { %v2028_v33 = vld [vmem:[#allocation5 + $0x108] sm:$0xff]  ;;  %1022 = vmatpush.bf16.msrb.mxu3 %v2024_v31  ;;  %v247_v0 = vadd.f32 %v2382_v57, %v2362_v45  ;;  %v2022_v45 = vld [vmem:[#allocation5 + $0xd8] sm:$0xff]  ;;  %v379_v57 = vadd.f32 %v2404_v5, %v271_v11  ;;  %v380_v31 = vadd.f32 %v2406_v9, %v250_v28 }
  0xf8   :  { %v597_v56 = vadd.f32 %v2417_v32, %v579_v36  ;;  %v598_v7 = vadd.f32 %v2419_v35, %v580_v44  ;;  %1116 = vmatpush.bf16.msrb.mxu0 %v2028_v33  ;;  %v483_v41 = vadd.f32 %v468_v20, %v377_v34  ;;  %v2004_v44 = vld [vmem:[#allocation5 + $0x48] sm:$0xff] }
  0xf9   :  { %771 = vmatpush.bf16.msra.mxu2 %v2004_v44  ;;  %v378_v15 = vadd.f32 %v2400_v3, %v247_v0  ;;  %v485_v46 = vadd.f32 %v470_v42, %v379_v57  ;;  %v2020_v25 = vld [vmem:[#allocation5 + $0xc8] sm:$0xff]  ;;  %v276_v0 = vadd.f32 %v2402_v4, %v2376_v52  ;;  %v2014_v4 = vld [vmem:[#allocation5 + $0x98] sm:$0xff] }
  0xfa   :  { %v609_v12 = vmax.f32 %v597_v56, 0.0  ;;  %v610_v39 = vmax.f32 %v598_v7, 0.0  ;;  %v2027_v56 = vld [vmem:[#allocation5 + $0x100] sm:$0xff]  ;;  %v2012_v28 = vld [vmem:[#allocation5 + $0x88] sm:$0xff] }
  0xfb   :  { %1023 = vmatpush.bf16.msrb.mxu3 %v2023_v55  ;;  %v484_v20 = vadd.f32 %v446_v53, %v378_v15 }
  0xfc   :  { %v2429_v22 = vmax.f32 %v609_v12, %v610_v39  ;;  %1117 = vmatpush.bf16.msrb.mxu0 %v2027_v56 }
  0xfd   :  { %v542_v40 = vpop.f32.mrf.mxu0  ;;  %v566_v23 = vpop.f32.mrf.mxu1  ;;  %772 = vmatpush.bf16.msra.mxu2 %v2003_v14 }
  0xfe   :  { %v581_v49 = vadd.f32 %v542_v40, %v480_v47  ;;  %v582_v27 = vadd.f32 %v566_v23, %v481_v21  ;;  %v633_v63 = vrot.slane %v2429_v22, 2  ;;  %v2018_v40 = vld [vmem:[#allocation5 + $0xb8] sm:$0xff]  ;;  %v475_v14 = vpop.f32.mrf.mxu3 }
  0xff   :  { %1024 = vmatpush.bf16.msrb.mxu3 %v2022_v45 }
 0x100   :  { %v599_v26 = vadd.f32 %v2417_v32, %v581_v49  ;;  %v600_v16 = vadd.f32 %v2419_v35, %v582_v27 }
 0x101   :  { %922 = vmatpush.bf16.msrb.mxu2 %v2018_v40 }
 0x102   :  { %v611_v30 = vmax.f32 %v599_v26, 0.0  ;;  %v612_v36 = vmax.f32 %v600_v16, 0.0  ;;  %v2017_v26 = vld [vmem:[#allocation5 + $0xb0] sm:$0xff]  ;;  %v274_v16 = vadd.f32 %v2392_v62, %v2372_v50 }
 0x103   :  { %1025 = vmatpush.bf16.msrb.mxu3 %v2021_v24 }
 0x104   :  { %v622_v38 = vmax.f32 %v611_v30, %v612_v36  ;;  %v381_v48 = vadd.f32 %v2408_v10, %v274_v16  ;;  %v252_v10 = vadd.f32 %v2398_v2, %v2374_v51  ;;  %v383_v51 = vadd.f32 %v2412_v19, %v276_v0  ;;  %v2011_v16 = vld [vmem:[#allocation5 + $0x80] sm:$0xff] }
 0x105   :  { %v545_v43 = vpop.f32.mrf.mxu0  ;;  %v569_v1 = vpop.f32.mrf.mxu1  ;;  %923 = vmatpush.bf16.msrb.mxu2 %v2017_v26 }
 0x106   :  { %v583_v54 = vadd.f32 %v545_v43, %v482_v37  ;;  %v634_v6 = vrot.slane %v622_v38, 2  ;;  %v584_v7 = vadd.f32 %v569_v1, %v483_v41  ;;  %v2016_v37 = vld [vmem:[#allocation5 + $0xa8] sm:$0xff]  ;;  %v486_v41 = vadd.f32 %v449_v59, %v380_v31  ;;  %v2019_v43 = vld [vmem:[#allocation5 + $0xc0] sm:$0xff] }
 0x107   :  { %1026 = vmatpush.bf16.msrb.mxu3 %v2020_v25  ;;  %v487_v44 = vadd.f32 %v473_v60, %v381_v48  ;;  %v489_v57 = vadd.f32 %v475_v14, %v383_v51  ;;  %v2042_v14 = vld [vmem:[%s2602_s5 + $0x38] sm:$0xff] }
 0x108   :  { %v601_v8 = vadd.f32 %v2417_v32, %v583_v54  ;;  %v602_v12 = vadd.f32 %v2419_v35, %v584_v7  ;;  %v635_v13 = vsel %vm142_vm0, %v633_v63, %v634_v6  ;;  %v2050_v51 = vld [vmem:[%s2602_s5 + $0x78] sm:$0xff] }
 0x109   :  { %v652_v39 = vmax.f32 %v2429_v22, %v635_v13  ;;  %924 = vmatpush.bf16.msrb.mxu2 %v2016_v37  ;;  %v382_v13 = vadd.f32 %v2410_v18, %v252_v10  ;;  %v2013_v18 = vld [vmem:[#allocation5 + $0x90] sm:$0xff] }
 0x10a   :  { %v613_v17 = vmax.f32 %v601_v8, 0.0  ;;  %v614_v47 = vmax.f32 %v602_v12, 0.0  ;;  %v451_v8 = vpop.f32.mrf.mxu2 }
 0x10b   :  { %v658_v36 = vpack.c.bf16 %v652_v39, %v652_v39  ;;  %1027 = vmatpush.bf16.msrb.mxu3 %v2019_v43  ;;  %v488_v39 = vadd.f32 %v451_v8, %v382_v13 }
 0x10c   :  { %v623_v58 = vmax.f32 %v613_v17, %v614_v47 }
 0x10d   :  { %v547_v21 = vpop.f32.mrf.mxu0  ;;  %v571_v23 = vpop.f32.mrf.mxu1  ;;  %v702_v1 = vunpack.c.l.b16 %v658_v36 }
 0x10e   :  { %v585_v49 = vadd.f32 %v547_v21, %v484_v20  ;;  %v636_v27 = vrot.slane %v623_v58, 2  ;;  %v586_v3 = vadd.f32 %v571_v23, %v485_v46 }
 0x110   :  { %v603_v5 = vadd.f32 %v2417_v32, %v585_v49  ;;  %v604_v29 = vadd.f32 %v2419_v35, %v586_v3  ;;  %v637_v30 = vsel %vm142_vm0, %v634_v6, %v636_v27 }
 0x111   :  { %v653_v34 = vmax.f32 %v622_v38, %v637_v30  ;;  %v2015_v38 = vld [vmem:[#allocation5 + $0xa0] sm:$0xff] }
 0x112   :  { %v615_v33 = vmax.f32 %v603_v5, 0.0  ;;  %v616_v61 = vmax.f32 %v604_v29, 0.0  ;;  %925 = vmatpush.bf16.msrb.mxu2 %v2015_v38 }
 0x113   :  { %v659_v53 = vpack.c.bf16 %v653_v34, %v653_v34 }
 0x114   :  { %v624_v50 = vmax.f32 %v615_v33, %v616_v61 }
 0x115   :  { %v550_v62 = vpop.f32.mrf.mxu0  ;;  %v574_v54 = vpop.f32.mrf.mxu1  ;;  %v703_v55 = vunpack.c.l.b16 %v659_v53 }
 0x116   :  { %v587_v42 = vadd.f32 %v550_v62, %v486_v41  ;;  %v638_v9 = vrot.slane %v624_v50, 2  ;;  %v588_v56 = vadd.f32 %v574_v54, %v487_v44  ;;  %926 = vmatpush.bf16.msrb.mxu2 %v2014_v4  ;;  %v2040_v4 = vld [vmem:[%s2602_s5 + $0x28] sm:$0xff] }
 0x117   :  { %v707_v7 = vpack.c.b16 %v703_v55, %v702_v1 }
 0x118   :  { %v605_v6 = vadd.f32 %v2417_v32, %v587_v42  ;;  %v606_v11 = vadd.f32 %v2419_v35, %v588_v56  ;;  %v639_v12 = vsel %vm142_vm0, %v636_v27, %v638_v9 }
 0x119   :  { %842 = vmatmul.bf16.vlgmr.msra.gmra.mxu3 %v707_v7  ;;  %v654_v17 = vmax.f32 %v623_v58, %v639_v12  ;;  %v710_v31 = vrot.slane %v707_v7, 2 }
 0x11a   :  { %v617_v15 = vmax.f32 %v605_v6, 0.0  ;;  %v618_v2 = vmax.f32 %v606_v11, 0.0  ;;  %927 = vmatpush.bf16.msrb.mxu2 %v2013_v18  ;;  %1371 = vmatpush.bf16.msra.mxu3 %v2050_v51 }
 0x11b   :  { %v660_v45 = vpack.c.bf16 %v654_v17, %v654_v17 }
 0x11c   :  { %v625_v47 = vmax.f32 %v617_v15, %v618_v2  ;;  %v2038_v15 = vld [vmem:[%s2602_s5 + $0x18] sm:$0xff] }
 0x11d   :  { %v552_v52 = vpop.f32.mrf.mxu0  ;;  %v576_v46 = vpop.f32.mrf.mxu1  ;;  %v704_v21 = vunpack.c.l.b16 %v660_v45  ;;  %1272 = vmatpush.bf16.msrb.mxu1 %v2038_v15  ;;  %v2037_v45 = vld [vmem:[%s2602_s5 + $0x10] sm:$0xff] }
 0x11e   :  { %v589_v20 = vadd.f32 %v552_v52, %v488_v39  ;;  %v640_v40 = vrot.slane %v625_v47, 2  ;;  %v590_v49 = vadd.f32 %v576_v46, %v489_v57  ;;  %928 = vmatpush.bf16.msrb.mxu2 %v2012_v28  ;;  %v2041_v39 = vld [vmem:[%s2602_s5 + $0x30] sm:$0xff] }
 0x11f   :  { %v870_v58 = vpack.c.b16 %v704_v21, %v703_v55 }
 0x120   :  { %v607_v23 = vadd.f32 %v2417_v32, %v589_v20  ;;  %v608_v19 = vadd.f32 %v2419_v35, %v590_v49  ;;  %v641_v24 = vsel %vm142_vm0, %v638_v9, %v640_v40 }
 0x121   :  { %v655_v27 = vmax.f32 %v624_v50, %v641_v24  ;;  %v965_v50 = vrot.slane %v870_v58, 2  ;;  %1273 = vmatpush.bf16.msrb.mxu1 %v2037_v45 }
 0x122   :  { %v619_v59 = vmax.f32 %v607_v23, 0.0  ;;  %v620_v3 = vmax.f32 %v608_v19, 0.0  ;;  %929 = vmatpush.bf16.msrb.mxu2 %v2011_v16 }
 0x123   :  { %v661_v60 = vpack.c.bf16 %v655_v27, %v655_v27 }
 0x124   :  { %v626_v5 = vmax.f32 %v619_v59, %v620_v3  ;;  %v2108_v59 = vld [vmem:[%s2601_s4] ss:$0 sm:$0xff] }
 0x125   :  { %v705_v26 = vunpack.c.l.b16 %v661_v60 }
 0x126   :  { %v642_v25 = vrot.slane %v626_v5, 2 }
 0x127   :  { %v708_v29 = vpack.c.b16 %v705_v26, %v704_v21 }
 0x128   :  { %v643_v30 = vsel %vm142_vm0, %v640_v40, %v642_v25  ;;  %v651_v32 = vsel %vm142_vm0, %v642_v25, %v633_v63 }
 0x129   :  { %v656_v35 = vmax.f32 %v625_v47, %v643_v30  ;;  %847 = vmatmul.bf16.gmra.mxu3 %v708_v29  ;;  %1118 = vmatmul.bf16.vlgmr.msrb.gmra.mxu0 %v708_v29  ;;  %v711_v33 = vrot.slane %v708_v29, 2  ;;  %v657_v34 = vmax.f32 %v626_v5, %v651_v32 }
 0x12b   :  { %v662_v36 = vpack.c.bf16 %v656_v35, %v656_v35  ;;  %v712_v48 = vsel %vm142_vm0, %v710_v31, %v711_v33  ;;  %v663_v61 = vpack.c.bf16 %v657_v34, %v657_v34 }
 0x12c   :  { %773 = vmatmul.bf16.vlgmr.msra.gmra.mxu2 %v712_v48 }
 0x12d   :  { %v706_v37 = vunpack.c.l.b16 %v662_v36  ;;  %v963_v41 = vunpack.c.l.b16 %v663_v61  ;;  %1232 = vmatpush.bf16.msra.mxu2 %v2042_v14 }
 0x12f   :  { %v871_v53 = vpack.c.b16 %v706_v37, %v705_v26  ;;  %v1060_v43 = vpack.c.b16 %v963_v41, %v706_v37  ;;  %v709_v44 = vpack.c.b16 %v706_v37, %v706_v37  ;;  %v964_v22 = vpack.c.b16 %v963_v41, %v963_v41 }
 0x131   :  { %v966_v63 = vrot.slane %v871_v53, 2  ;;  %v713_v62 = vrot.slane %v709_v44, 2  ;;  %v968_v42 = vrot.slane %v964_v22, 2  ;;  %1233 = vmatpush.bf16.msra.mxu2 %v2041_v39  ;;  %v2036_v44 = vld [vmem:[%s2602_s5 + $0x8] sm:$0xff]  ;;  %v2046_v22 = vld [vmem:[%s2602_s5 + $0x58] sm:$0xff] }
 0x132   :  { %1274 = vmatpush.bf16.msrb.mxu1 %v2036_v44 }
 0x133   :  { %v967_v54 = vsel %vm142_vm0, %v965_v50, %v966_v63  ;;  %v714_v1 = vsel %vm142_vm0, %v711_v33, %v713_v62  ;;  %v969_v55 = vsel %vm142_vm0, %v966_v63, %v968_v42  ;;  %v2048_v50 = vld [vmem:[%s2602_s5 + $0x68] sm:$0xff]  ;;  %v2045_v63 = vld [vmem:[%s2602_s5 + $0x50] sm:$0xff]  ;;  %v2035_v62 = vld [vmem:[%s2602_s5] sm:$0xff] }
 0x134   :  { %v2047_v42 = vld [vmem:[%s2602_s5 + $0x60] sm:$0xff] }
 0x135   :  { %1234 = vmatpush.bf16.msra.mxu2 %v2040_v4 }
 0x136   :  { %1275 = vmatpush.bf16.msrb.mxu1 %v2035_v62  ;;  %v2058_v62 = vld [vmem:[%s2606_s9] sm:$0xff] }
 0x139   :  { %1028 = vmatmul.bf16.vlgmr.msrb.gmra.mxu3 %v967_v54  ;;  %1123 = vmatmul.bf16.gmra.mxu0 %v1060_v43  ;;  %v2049_v43 = vld [vmem:[%s2602_s5 + $0x70] sm:$0xff]  ;;  %v2044_v54 = vld [vmem:[%s2602_s5 + $0x48] sm:$0xff] }
 0x13a   :  { %1372 = vmatpush.bf16.msra.mxu3 %v2049_v43 }
 0x13c   :  { %778 = vmatmul.bf16.gmra.mxu2 %v714_v1  ;;  %v2043_v1 = vld [vmem:[%s2602_s5 + $0x40] sm:$0xff] }
 0x13e   :  { %1373 = vmatpush.bf16.msra.mxu3 %v2048_v50 }
 0x142   :  { %1374 = vmatpush.bf16.msra.mxu3 %v2047_v42  ;;  %v2110_v42 = vld [vmem:[%s2605_s8] ss:$0 sm:$0xff] }
 0x149   :  { %1033 = vmatmul.bf16.gmra.mxu3 %v969_v55  ;;  %v1402_v55 = vld [vmem:[%s2604_s7 + $0x38] sm:$0xf] }
 0x14c   :  { %930 = vmatmul.bf16.vlgmr.msrb.gmra.mxu2 %v870_v58 }
 0x15c   :  { %935 = vmatmul.bf16.gmra.mxu2 %v871_v53  ;;  %v2039_v53 = vld [vmem:[%s2602_s5 + $0x20] sm:$0xff] }
 0x15d   :  { %1235 = vmatpush.bf16.msra.mxu2 %v2039_v53 }
 0x161   :  { %1321 = vmatpush.bf16.msrb.mxu2 %v2046_v22 }
 0x165   :  { %1322 = vmatpush.bf16.msrb.mxu2 %v2045_v63  ;;  %v2059_v63 = vld [vmem:[%s2606_s9 + $0x8] sm:$0xff] }
 0x169   :  { %1323 = vmatpush.bf16.msrb.mxu2 %v2044_v54 }
 0x16d   :  { %1324 = vmatpush.bf16.msrb.mxu2 %v2043_v1 }
 0x19c   :  { %v843_v9 = vpop.f32.mrf.mxu3 }
 0x1a4   :  { %v845_v56 = vpop.f32.mrf.mxu3 }
 0x1a6   :  { %v1119_v12 = vpop.f32.mrf.mxu0 }
 0x1ac   :  { %v848_v10 = vpop.f32.mrf.mxu3 }
 0x1ae   :  { %v1121_v57 = vpop.f32.mrf.mxu0 }
 0x1af   :  { %v774_v38 = vpop.f32.mrf.mxu2 }
 0x1b0   :  { %v844_v46 = vadd.f32 %v843_v9, %v774_v38  ;;  %v1436_v9 = vunpack.c.l.b16 %v1402_v55 }
 0x1b4   :  { %v850_v0 = vpop.f32.mrf.mxu3 }
 0x1b6   :  { %v1124_v19 = vpop.f32.mrf.mxu0 }
 0x1b7   :  { %v776_v6 = vpop.f32.mrf.mxu2 }
 0x1b8   :  { %v846_v2 = vadd.f32 %v845_v56, %v776_v6  ;;  %v1444_v56 = vpack.c.b16 %v1436_v9, %v1436_v9 }
 0x1bc   :  { %v1029_v11 = vpop.f32.mrf.mxu3 }
 0x1be   :  { %v1126_v33 = vpop.f32.mrf.mxu0 }
 0x1bf   :  { %v779_v7 = vpop.f32.mrf.mxu2 }
 0x1c0   :  { %v849_v21 = vadd.f32 %v848_v10, %v779_v7  ;;  %v1457_v7 = vsel %vm1161_vm4, %v1444_v56, 0 }
 0x1c1   :  { %1459 = vmatpush.bf16.msra.mxu0 %v1457_v7 }
 0x1c4   :  { %v1031_v17 = vpop.f32.mrf.mxu3 }
 0x1c7   :  { %v781_v8 = vpop.f32.mrf.mxu2 }
 0x1c8   :  { %v851_v60 = vadd.f32 %v850_v0, %v781_v8  ;;  %v2057_v0 = vld [vmem:[%s2604_s7 + $0x30] sm:$0xff] }
 0x1c9   :  { %1460 = vmatpush.bf16.msra.mxu0 %v2057_v0 }
 0x1cc   :  { %v1034_v40 = vpop.f32.mrf.mxu3 }
 0x1cf   :  { %v931_v13 = vpop.f32.mrf.mxu2 }
 0x1d0   :  { %v941_v18 = vadd.f32 %v931_v13, %v844_v46 }
 0x1d2   :  { %v1039_v27 = vadd.f32 %v1029_v11, %v941_v18 }
 0x1d4   :  { %v1129_v25 = vadd.f32 %v1119_v12, %v1039_v27  ;;  %v1036_v32 = vpop.f32.mrf.mxu3  ;;  %v2053_v27 = vld [vmem:[%s2604_s7 + $0x10] sm:$0xff] }
 0x1d6   :  { %v1137_v36 = vadd.f32 %v2108_v59, %v1129_v25 }
 0x1d7   :  { %v933_v47 = vpop.f32.mrf.mxu2 }
 0x1d8   :  { %v942_v52 = vadd.f32 %v933_v47, %v846_v2  ;;  %v1141_v61 = vmax.f32 %v1137_v36, 0.0 }
 0x1da   :  { %v1040_v20 = vadd.f32 %v1031_v17, %v942_v52 }
 0x1dc   :  { %v1130_v58 = vadd.f32 %v1121_v57, %v1040_v20 }
 0x1de   :  { %v1138_v28 = vadd.f32 %v2108_v59, %v1130_v58 }
 0x1df   :  { %v936_v49 = vpop.f32.mrf.mxu2 }
 0x1e0   :  { %v943_v23 = vadd.f32 %v936_v49, %v849_v21  ;;  %v1142_v29 = vmax.f32 %v1138_v28, 0.0  ;;  %v2051_v28 = vld [vmem:[%s2604_s7] sm:$0xff] }
 0x1e2   :  { %v1041_v24 = vadd.f32 %v1034_v40, %v943_v23 }
 0x1e4   :  { %v1131_v3 = vadd.f32 %v1124_v19, %v1041_v24  ;;  %v2056_v19 = vld [vmem:[%s2604_s7 + $0x28] sm:$0xff]  ;;  %v2055_v24 = vld [vmem:[%s2604_s7 + $0x20] sm:$0xff] }
 0x1e5   :  { %1461 = vmatpush.bf16.msra.mxu0 %v2056_v19 }
 0x1e6   :  { %v1139_v5 = vadd.f32 %v2108_v59, %v1131_v3  ;;  %v2052_v3 = vld [vmem:[%s2604_s7 + $0x8] sm:$0xff] }
 0x1e7   :  { %v938_v26 = vpop.f32.mrf.mxu2 }
 0x1e8   :  { %v944_v16 = vadd.f32 %v938_v26, %v851_v60  ;;  %v1143_v30 = vmax.f32 %v1139_v5, 0.0  ;;  %v1484_v60 = vld [vmem:[%s2606_s9 + $0x28] sm:$0x3] }
 0x1e9   :  { %1462 = vmatpush.bf16.msra.mxu0 %v2055_v24  ;;  %v1510_v5 = vunpack.c.l.b16 %v1484_v60 }
 0x1ea   :  { %v1042_v35 = vadd.f32 %v1036_v32, %v944_v16  ;;  %v2098_v31 = vpack.i.bf16 %v1143_v30, %v1142_v29  ;;  %v2061_v32 = vld [vmem:[%s2606_s9 + $0x18] sm:$0xff] }
 0x1eb   :  { %v1516_v26 = vpack.c.b16 %v1510_v5, %v1510_v5 }
 0x1ec   :  { %v1132_v34 = vadd.f32 %v1126_v33, %v1042_v35  ;;  %2099 = vrot.lane.b32.xlu0 %v2098_v31, %s2194_s29  ;;  %v2060_v33 = vld [vmem:[%s2606_s9 + $0x10] sm:$0xff] }
 0x1ed   :  { %v1528_v16 = vsel %vm1526_vm6, %v1516_v26, 0 }
 0x1ee   :  { %v1140_v48 = vadd.f32 %v2108_v59, %v1132_v34  ;;  %v2054_v59 = vld [vmem:[%s2604_s7 + $0x18] sm:$0xff]  ;;  %1532 = vmatpush.bf16.msra.mxu1 %v1528_v16 }
 0x1ef   :  { %1463 = vmatpush.bf16.msra.mxu0 %v2054_v59 }
 0x1f0   :  { %v1144_v37 = vmax.f32 %v1140_v48, 0.0 }
 0x1f2   :  { %v2103_v41 = vpack.i.bf16 %v1141_v61, %v1144_v37 }
 0x1f3   :  { %1464 = vmatpush.bf16.msra.mxu0 %v2053_v27 }
 0x1f4   :  { %2104 = vrot.lane.b32.xlu0 %v2103_v41, %s2194_s29  ;;  %v2109_v41 = vld [vmem:[%s2603_s6] ss:$0 sm:$0xff] }
 0x1f7   :  { %1465 = vmatpush.bf16.msra.mxu0 %v2052_v3 }
 0x1fb   :  { %1466 = vmatpush.bf16.msra.mxu0 %v2051_v28 }
 0x25e   :  { %v2100_v38 = vpop.permute.xlu0 %2099 }
 0x25f   :  { %v2102_v10 = vunpack.i.h.bf16 %v2100_v38  ;;  %v2101_v6 = vunpack.i.l.bf16 %v2100_v38  ;;  %v2111_v38 = vld [vmem:[%s2607_s10] ss:$0 sm:$0xff] }
 0x261   :  { %v1155_v8 = vmax.f32 %v1143_v30, %v2102_v10  ;;  %v1154_v11 = vmax.f32 %v1142_v29, %v2101_v6  ;;  %v2062_v29 = vld [vmem:[%s2606_s9 + $0x20] sm:$0xff] }
 0x262   :  { %1533 = vmatpush.bf16.msra.mxu1 %v2062_v29 }
 0x263   :  { %v1165_v12 = vrot.slane %v1155_v8, 4  ;;  %v1163_v13 = vrot.slane %v1154_v11, 4 }
 0x265   :  { %v1166_v14 = vsel %vm1161_vm4, %v1163_v13, %v1165_v12 }
 0x266   :  { %v1176_v15 = vmax.f32 %v1154_v11, %v1166_v14  ;;  %v2105_v17 = vpop.permute.xlu0 %2104  ;;  %1534 = vmatpush.bf16.msra.mxu1 %v2061_v32 }
 0x267   :  { %v2107_v51 = vunpack.i.h.bf16 %v2105_v17  ;;  %v2106_v2 = vunpack.i.l.bf16 %v2105_v17 }
 0x268   :  { %v1180_v39 = vpack.c.bf16 %v1176_v15, %v1176_v15 }
 0x269   :  { %v1153_v45 = vmax.f32 %v1141_v61, %v2107_v51  ;;  %v1156_v57 = vmax.f32 %v1144_v37, %v2106_v2 }
 0x26a   :  { %1857 = vmatmul.msk.bf16.vlgmr.msra.gmra.mxu2 %vm1224_vm5, %v1180_v39  ;;  %1535 = vmatpush.bf16.msra.mxu1 %v2060_v33 }
 0x26b   :  { %v1162_v47 = vrot.slane %v1153_v45, 4  ;;  %v1167_v52 = vrot.slane %v1156_v57, 4 }
 0x26d   :  { %v1164_v4 = vsel %vm1161_vm4, %v1162_v47, %v1163_v13  ;;  %v1174_v20 = vsel %vm1161_vm4, %v1167_v52, %v1162_v47  ;;  %v1168_v18 = vsel %vm1161_vm4, %v1165_v12, %v1167_v52 }
 0x26e   :  { %v1175_v46 = vmax.f32 %v1153_v45, %v1164_v4  ;;  %v1178_v21 = vmax.f32 %v1156_v57, %v1174_v20  ;;  %v1177_v23 = vmax.f32 %v1155_v8, %v1168_v18  ;;  %1536 = vmatpush.bf16.msra.mxu1 %v2059_v63 }
 0x270   :  { %v1179_v40 = vpack.c.bf16 %v1175_v46, %v1175_v46  ;;  %v1182_v49 = vpack.c.bf16 %v1178_v21, %v1178_v21  ;;  %v1181_v58 = vpack.c.bf16 %v1177_v23, %v1177_v23 }
 0x272   :  { %1874 = vmatmul.msk.bf16.vlgmr.msrb.gmra.mxu1 %vm1224_vm5, %v1179_v40  ;;  %1924 = vmatmul.msk.bf16.vlgmr.msra.gmra.mxu3 %vm1224_vm5, %v1182_v49 }
 0x273   :  { %1537 = vmatpush.bf16.msra.mxu1 %v2058_v62 }
 0x27a   :  { %1899 = vmatmul.msk.bf16.vlgmr.msrb.gmra.mxu2 %vm1224_vm5, %v1181_v58 }
 0x2ed   :  { %v1237_v25 = vpop.f32.mrf.mxu2 }
 0x2ef   :  { %v1277_v30 = vpop.f32.mrf.mxu1 }
 0x2f0   :  { %v1278_v36 = vadd.f32 %v1277_v30, %v1237_v25 }
 0x2f5   :  { %v1239_v35 = vpop.f32.mrf.mxu2  ;;  %v1376_v31 = vpop.f32.mrf.mxu3 }
 0x2f7   :  { %v1279_v34 = vpop.f32.mrf.mxu1 }
 0x2fd   :  { %v1326_v48 = vpop.f32.mrf.mxu2  ;;  %v1378_v61 = vpop.f32.mrf.mxu3 }
 0x2fe   :  { %v1330_v37 = vadd.f32 %v1326_v48, %v1278_v36 }
 0x300   :  { %v1380_v53 = vadd.f32 %v1376_v31, %v1330_v37 }
 0x302   :  { %v1385_v43 = vadd.f32 %v2109_v41, %v1380_v53 }
 0x304   :  { %v1386_v44 = vmax.f32 %v1385_v43, 0.0 }
 0x305   :  { %v1328_v22 = vpop.f32.mrf.mxu2 }
 0x306   :  { %v1387_v50 = vpack.c.bf16 %v1386_v44, %v1386_v44 }
 0x308   :  { %1953 = vmatmul.msk.bf16.vlgmr.msra.gmra.mxu0 %vm1452_vm7, %v1387_v50 }
 0x385   :  { %v1468_v54 = vpop.f32.mrf.mxu0 }
 0x386   :  { %v1469_v1 = vadd.f32 %v2110_v42, %v1468_v54 }
 0x388   :  { %v1472_v55 = vmax.f32 %v1469_v1, 0.0 }
 0x38a   :  { %v1473_v9 = vpack.c.bf16 %v1472_v55, %v1472_v55 }
 0x38c   :  { %1974 = vmatmul.msk.bf16.vlgmr.msra.gmra.mxu1 %vm1522_vm8, %v1473_v9 }
 0x38d   :  { %v1470_v56 = vpop.f32.mrf.mxu0 }
 0x409   :  { %v1539_v10 = vpop.f32.mrf.mxu1 }
 0x40a   :  { %v1540_v6 = vadd.f32 %v2111_v38, %v1539_v10 }
 0x40c   :  { %1544 = vst.msk [vmem:[#allocation7] sm:$0x3] %vm1543_vm9, %v1540_v6 }
 0x40d   :  { %1555 = dma.vmem_to_hbm [thread:$0]  %s1551_s18, 32, %s1553_s20, [#allocation4]  }
 0x411   :  { %v1541_v7 = vpop.f32.mrf.mxu1 }
 0x412   :  { %2188 = dma.done.wait [#allocation4], 32  }
 0x413   :  { %2189 = vsyncadd [#allocation4], 4294967264 }
 0x414   :  { %1560 = vsyncpa [#allocation3], 1 }
 0x415   :  { %1561 = vsyncpa [#allocation6], 1 }
 0x416   :  { %1562 = vsyncpa [#allocation4], 1 }

</bundles_post_ra>
